<compile_context>
chip_gen: v7x
topology: tpu7x:2x2x1
jax: 0.10.0
libtpu: 0.0.40
codegen_flags: <defaults>
</compile_context>

<pallas_src>
import math

import jax
import jax.numpy as jnp
from jax import lax
from jax.experimental import pallas as pl
from jax.experimental.pallas import tpu as pltpu

LN_EPS = 1e-5     # nn.LayerNorm default
LIF_TAU = 2.0     # MultiStepLIFNode(tau=2.0)
LIF_VTH = 1.0     # default v_threshold (v_reset = 0.0, decay_input = True)


# ----------------------- VMEM budget (generation aware) -----------------------

def _vmem_capacity():
    try:
        return int(pltpu.get_tpu_info().vmem_capacity_bytes)
    except Exception:
        return 64 * 1024 * 1024          # conservative fallback (v7x per-core)


_VMEM_CAP = _vmem_capacity()
_VMEM_LIMIT = min((_VMEM_CAP * 3) // 4, 96 * 1024 * 1024)   # explicit scoped cap
_VMEM_PLAN = (_VMEM_LIMIT * 3) // 4                          # tiling plans to this


def _cparams(*sem):
    return pltpu.CompilerParams(dimension_semantics=sem,
                                vmem_limit_bytes=_VMEM_LIMIT)


# ------------------------------ tiling helpers --------------------------------

def _round_up(x, m):
    return ((x + m - 1) // m) * m


def _pad_rows(x2d, tm):
    pad = (-x2d.shape[0]) % tm
    return jnp.pad(x2d, ((0, pad), (0, 0))) if pad else x2d


def _pad_axis(x, axis, size):
    pad = size - x.shape[axis]
    if pad <= 0:
        return x
    widths = [(0, 0)] * x.ndim
    widths[axis] = (0, pad)
    return jnp.pad(x, widths)


def _pick_tm(rows, k, n):
    """Row tile (multiple of 8): biggest whose double-buffered row blocks plus
    the resident weight fit the VMEM plan; prefers >=2 grid blocks."""
    cap = _round_up(max(rows, 1), 8)
    wbytes = k * n * 2 + 4 * n * 4
    for tm in (1024, 512, 256, 128, 64, 32, 16, 8):
        if tm > cap:
            continue
        if tm == cap and tm > 8:        # keep >=2 blocks (pipelining / v7x 2-TC)
            continue
        if 2 * tm * (k + 2 * n) * 4 + wbytes <= _VMEM_PLAN:
            return tm
    return 8


def _lif_tiles(r):
    """(padded rows, row tile) for the LIF kernel's (rows, 128) per-step view."""
    if r <= 8:
        return max(r, 1), max(r, 1)
    rp = _round_up(r, 8)
    for t in (1024, 512, 256, 128, 64, 32, 16, 8):
        if rp % t == 0:
            return rp, t
    return rp, 8


def _pick_scan_tiles(TB, L, D):
    """(tbt, TBp, Lc) for the scan: batch sublane tile, padded batch, L chunk."""
    tb8 = _round_up(max(TB, 1), 8)
    if tb8 <= 64:
        tbt, TBp = tb8, tb8
    else:
        ntiles = -(-TB // 64)
        tbt = _round_up(-(-TB // ntiles), 8)
        TBp = tbt * ntiles

    def max_lc(t):
        # 12 inputs + 4 outputs, double buffered, f32
        return max(1, _VMEM_PLAN // (32 * t * D * 4))

    while tbt > 8 and max_lc(tbt) < min(L, 16):
        tbt -= 8
        TBp = _round_up(TB, tbt)
    lc_cap = min(L, max_lc(tbt))
    lc = next(l for l in range(lc_cap, 0, -1) if L % l == 0)
    return tbt, TBp, lc


# --------------------------------- matmuls ------------------------------------

def matmul_bias(x, w, b=None, act=None, residual=None, out_dtype=None):
    """y = act(x @ w + b) (+ residual).  bf16 MXU operands, f32 accumulate."""
    rows, k = x.shape
    n = w.shape[1]
    out_dtype = out_dtype or x.dtype
    tm = _pick_tm(rows, k, n * (2 if residual is not None else 1))
    xp = _pad_rows(x, tm)
    nrows = xp.shape[0]
    b2 = (jnp.zeros((1, n), jnp.float32) if b is None
          else b.reshape(1, n).astype(jnp.float32))
    wb = w.astype(jnp.bfloat16)

    args = [xp, wb, b2]
    in_specs = [pl.BlockSpec((tm, k), lambda i: (i, 0)),
                pl.BlockSpec((k, n), lambda i: (0, 0)),
                pl.BlockSpec((1, n), lambda i: (0, 0))]
    if residual is not None:
        args.append(_pad_rows(residual, tm))
        in_specs.append(pl.BlockSpec((tm, n), lambda i: (i, 0)))

    def kernel(*refs):
        if residual is not None:
            x_ref, w_ref, b_ref, r_ref, o_ref = refs
        else:
            x_ref, w_ref, b_ref, o_ref = refs
        y = jnp.dot(x_ref[...].astype(jnp.bfloat16), w_ref[...],
                    preferred_element_type=jnp.float32) + b_ref[...]
        if act == "silu":
            y = y * jax.nn.sigmoid(y)
        if residual is not None:
            y = y + r_ref[...].astype(jnp.float32)
        o_ref[...] = y.astype(o_ref.dtype)

    # TODO(synk): for C >= 256 add K/N blocking (3-D grid + f32 acc scratch).
    out = pl.pallas_call(
        kernel,
        out_shape=jax.ShapeDtypeStruct((nrows, n), out_dtype),
        grid=(nrows // tm,),
        in_specs=in_specs,
        out_specs=pl.BlockSpec((tm, n), lambda i: (i, 0)),
        compiler_params=_cparams("parallel"),
    )(*args)
    return out[:rows]


def ln_matmul(x, gamma, beta, w, b=None, act=None, also_out_norm=False,
              extra=None, extra_scale=None, out_dtype=None, eps=LN_EPS):
    """Fused channel LayerNorm + matmul: y = act(LN(x [+ scale*extra]) @ w + b).
    Optionally also returns LN(...) (reused later as gate / residual)."""
    rows, c = x.shape
    n = w.shape[1]
    out_dtype = out_dtype or x.dtype
    tm = _pick_tm(rows, c * (2 if extra is not None else 1),
                  n + (c if also_out_norm else 0))
    xp = _pad_rows(x, tm)
    nrows = xp.shape[0]
    g2 = gamma.reshape(1, c).astype(jnp.float32)
    be2 = beta.reshape(1, c).astype(jnp.float32)
    b2 = (jnp.zeros((1, n), jnp.float32) if b is None
          else b.reshape(1, n).astype(jnp.float32))
    wb = w.astype(jnp.bfloat16)

    args = [xp, g2, be2, wb, b2]
    in_specs = [pl.BlockSpec((tm, c), lambda i: (i, 0)),
                pl.BlockSpec((1, c), lambda i: (0, 0)),
                pl.BlockSpec((1, c), lambda i: (0, 0)),
                pl.BlockSpec((c, n), lambda i: (0, 0)),
                pl.BlockSpec((1, n), lambda i: (0, 0))]
    if extra is not None:
        es = (jnp.ones((1, c), jnp.float32) if extra_scale is None
              else extra_scale.reshape(1, c).astype(jnp.float32))
        args += [_pad_rows(extra, tm), es]
        in_specs += [pl.BlockSpec((tm, c), lambda i: (i, 0)),
                     pl.BlockSpec((1, c), lambda i: (0, 0))]

    def kernel(*refs):
        x_ref, g_ref, be_ref, w_ref, b_ref = refs[:5]
        idx = 5
        if extra is not None:
            e_ref, es_ref = refs[5:7]
            idx = 7
        o_refs = refs[idx:]
        xv = x_ref[...].astype(jnp.float32)
        if extra is not None:
            xv = xv + e_ref[...].astype(jnp.float32) * es_ref[...]
        mu = jnp.mean(xv, axis=-1, keepdims=True)
        var = jnp.mean((xv - mu) ** 2, axis=-1, keepdims=True)
        xn = (xv - mu) * lax.rsqrt(var + eps) * g_ref[...] + be_ref[...]
        y = jnp.dot(xn.astype(jnp.bfloat16), w_ref[...],
                    preferred_element_type=jnp.float32) + b_ref[...]
        if act == "silu":
            y = y * jax.nn.sigmoid(y)
        o_refs[0][...] = y.astype(o_refs[0].dtype)
        if also_out_norm:
            o_refs[1][...] = xn.astype(o_refs[1].dtype)

    out_shape = [jax.ShapeDtypeStruct((nrows, n), out_dtype)]
    out_specs = [pl.BlockSpec((tm, n), lambda i: (i, 0))]
    if also_out_norm:
        out_shape.append(jax.ShapeDtypeStruct((nrows, c), jnp.float32))
        out_specs.append(pl.BlockSpec((tm, c), lambda i: (i, 0)))

    outs = pl.pallas_call(
        kernel,
        out_shape=tuple(out_shape),
        grid=(nrows // tm,),
        in_specs=in_specs,
        out_specs=tuple(out_specs),
        compiler_params=_cparams("parallel"),
    )(*args)
    if also_out_norm:
        return outs[0][:rows], outs[1][:rows]
    return outs[0][:rows]


# ------------------------ 3x3 convolutions (halo kernels) ----------------------

def conv3x3(x, w_taps, b=None, act=None, out_dtype=None):
    """Dense 3x3 'same' conv, bias + optional SiLU fused, as 9 accumulated
    full-block MXU matmuls.  x: (N,H,W,Cin); w_taps: (9,Cin,Cout), tap dy*3+dx.
    Returns (N, H*W, Cout) (caller reshapes for free)."""
    n, h, w, cin = x.shape
    cout = w_taps.shape[-1]
    out_dtype = out_dtype or x.dtype
    xp = jnp.pad(x, ((0, 0), (1, 1), (1, 1), (0, 0)))
    b2 = (jnp.zeros((1, cout), jnp.float32) if b is None
          else b.reshape(1, cout).astype(jnp.float32))
    wb = w_taps.astype(jnp.bfloat16)

    def kernel(x_ref, w_ref, b_ref, o_ref):
        xv = x_ref[...]                                      # (h+2, w+2, cin)
        acc = jnp.zeros((h * w, cout), jnp.float32)
        for dy in range(3):
            for dx in range(3):
                patch = xv[dy:dy + h, dx:dx + w, :].reshape(h * w, cin)
                acc = acc + jnp.dot(patch.astype(jnp.bfloat16),
                                    w_ref[dy * 3 + dx],
                                    preferred_element_type=jnp.float32)
        acc = acc + b_ref[...]
        if act == "silu":
            acc = acc * jax.nn.sigmoid(acc)
        o_ref[...] = acc.astype(o_ref.dtype)

    # TODO(synk): for large H*W*C add spatial tiling of the image block.
    return pl.pallas_call(
        kernel,
        out_shape=jax.ShapeDtypeStruct((n, h * w, cout), out_dtype),
        grid=(n,),
        in_specs=[pl.BlockSpec((None, h + 2, w + 2, cin), lambda i: (i, 0, 0, 0)),
                  pl.BlockSpec((9, cin, cout), lambda i: (0, 0, 0)),
                  pl.BlockSpec((1, cout), lambda i: (0, 0))],
        out_specs=pl.BlockSpec((None, h * w, cout), lambda i: (i, 0, 0)),
        compiler_params=_cparams("parallel"),
    )(xp, wb, b2)


def dwconv3x3_silu(x, w_dw):
    """Depthwise 3x3 'same' conv (no bias) + SiLU: 9 shifted whole-plane MACs.
    x: (N,H,W,C); w_dw: (9,1,C) with tap order dy*3+dx."""
    n, h, w, c = x.shape
    xp = jnp.pad(x, ((0, 0), (1, 1), (1, 1), (0, 0)))

    def kernel(x_ref, w_ref, o_ref):
        xv = x_ref[...].astype(jnp.float32)                  # (h+2, w+2, c)
        acc = jnp.zeros((h, w, c), jnp.float32)
        for dy in range(3):
            for dx in range(3):
                acc = acc + xv[dy:dy + h, dx:dx + w, :] * w_ref[dy * 3 + dx]
        acc = acc * jax.nn.sigmoid(acc)                      # SiLU
        o_ref[...] = acc.astype(o_ref.dtype)

    return pl.pallas_call(
        kernel,
        out_shape=jax.ShapeDtypeStruct((n, h, w, c), jnp.float32),
        grid=(n,),
        in_specs=[pl.BlockSpec((None, h + 2, w + 2, c), lambda i: (i, 0, 0, 0)),
                  pl.BlockSpec((9, 1, c), lambda i: (0, 0, 0))],
        out_specs=pl.BlockSpec((None, h, w, c), lambda i: (i, 0, 0, 0)),
        compiler_params=_cparams("parallel"),
    )(xp, w_dw.astype(jnp.float32))


# ----------------------------------- LIF ---------------------------------------

def lif_multistep(x2, gate=None, tau=LIF_TAU, v_th=LIF_VTH, out_dtype=None):
    """spikingjelly MultiStepLIFNode forward (decay_input=True, hard reset to 0).
    x2: (T_steps, P); dim 0 is time.  If `gate` is given (same shape) the
    SpikeMamba gate + residual is fused: out = gate * spike + gate."""
    ts, P = x2.shape
    out_dtype = out_dtype or x2.dtype
    cols = 128
    r = -(-P // cols)
    rp, tr = _lif_tiles(r)
    Ppad = rp * cols
    have_gate = gate is not None

    def prep(a):
        return _pad_axis(a, 1, Ppad).reshape(ts, rp, cols)

    args = (prep(x2), prep(gate)) if have_gate else (prep(x2),)

    def kernel(*refs):
        if have_gate:
            x_ref, g_ref, o_ref, v_ref = refs
        else:
            x_ref, o_ref, v_ref = refs

        @pl.when(pl.program_id(1) == 0)
        def _init():
            v_ref[...] = jnp.zeros_like(v_ref)

        xv = x_ref[...].astype(jnp.float32)
        v_old = v_ref[...]
        v = v_old + (xv - v_old) * (1.0 / tau)               # charge (v_reset=0)
        spike = (v >= v_th).astype(jnp.float32)              # fire
        v_ref[...] = v * (1.0 - spike)                       # hard reset
        if have_gate:
            g = g_ref[...].astype(jnp.float32)
            o_ref[...] = (g * spike + g).astype(o_ref.dtype)
        else:
            o_ref[...] = spike.astype(o_ref.dtype)

    row_spec = pl.BlockSpec((None, tr, cols), lambda i, t: (t, i, 0))
    in_specs = [row_spec, row_spec] if have_gate else [row_spec]
    out = pl.pallas_call(
        kernel,
        out_shape=jax.ShapeDtypeStruct((ts, rp, cols), out_dtype),
        grid=(rp // tr, ts),
        in_specs=in_specs,
        out_specs=row_spec,
        scratch_shapes=[pltpu.VMEM((tr, cols), jnp.float32)],
        compiler_params=_cparams("parallel", "arbitrary"),
    )(*args)
    return out.reshape(ts, Ppad)[:, :P]


# ------------------------- selective scan (SS2D core) ---------------------------

def scan_precompute(x1r, w_all, dtb_flat, a_flat):
    """Fused (x_proj o dt_proj) matmul + scan-coefficient precompute.
    Outputs per row (direction-major blocks of D, dirs [row-f,row-b,col-f,col-b]):
      a = exp(softplus(dt + dt_bias) * A),  b = delta * B * x,  c = broadcast(C)."""
    rows, D = x1r.shape
    K4 = 4 * D
    ncol = w_all.shape[1]                                    # 4D + 8
    tm = _pick_tm(rows, D, 13 * D)
    xp = _pad_rows(x1r, tm)
    nrows = xp.shape[0]
    wb = w_all.astype(jnp.bfloat16)
    dtb2 = dtb_flat.reshape(1, K4).astype(jnp.float32)
    A2 = a_flat.reshape(1, K4).astype(jnp.float32)

    def kernel(x_ref, w_ref, dtb_ref, A_ref, oa_ref, ob_ref, oc_ref):
        xv = x_ref[...].astype(jnp.float32)
        z = jnp.dot(xv.astype(jnp.bfloat16), w_ref[...],
                    preferred_element_type=jnp.float32)      # (tm, 4D+8)
        raw = z[:, :K4] + dtb_ref[...]
        delta = jnp.where(raw > 20.0, raw,
                          jnp.log1p(jnp.exp(jnp.minimum(raw, 20.0))))  # softplus
        oa_ref[...] = jnp.exp(delta * A_ref[...])
        bparts, cparts = [], []
        for k in range(4):
            dk = delta[:, k * D:(k + 1) * D]
            Bk = z[:, K4 + k:K4 + k + 1]
            Ck = z[:, K4 + 4 + k:K4 + 4 + k + 1]
            bparts.append(dk * Bk * xv)
            cparts.append(jnp.broadcast_to(Ck, dk.shape))
        ob_ref[...] = jnp.concatenate(bparts, axis=-1)
        oc_ref[...] = jnp.concatenate(cparts, axis=-1)

    outs = pl.pallas_call(
        kernel,
        out_shape=tuple(jax.ShapeDtypeStruct((nrows, K4), jnp.float32)
                        for _ in range(3)),
        grid=(nrows // tm,),
        in_specs=[pl.BlockSpec((tm, D), lambda i: (i, 0)),
                  pl.BlockSpec((D, ncol), lambda i: (0, 0)),
                  pl.BlockSpec((1, K4), lambda i: (0, 0)),
                  pl.BlockSpec((1, K4), lambda i: (0, 0))],
        out_specs=tuple(pl.BlockSpec((tm, K4), lambda i: (i, 0))
                        for _ in range(3)),
        compiler_params=_cparams("parallel"),
    )(xp, wb, dtb2, A2)
    return tuple(o[:rows] for o in outs)


def selective_scan(a_row, a_col, b_row, b_col, c_row, c_col, tbt, Lc):
    """All 4 scan directions per step.  Each input: (2, L, TBp, D) f32 with
    axis0 = {forward, backward} for that spatial ordering.  The L axis is
    chunked on an 'arbitrary' grid axis; the recurrent state is carried in
    VMEM scratch.  Backward directions read/write their chunk in reverse so
    every output is already in forward spatial order."""
    _, L, TBp, D = a_row.shape
    nchunks = L // Lc
    nj = TBp // tbt

    def kernel(arf, acf, brf, bcf, crf, ccf,
               arb, acb, brb, bcb, crb, ccb,
               yrf, ycf, yrb, ycb, h_ref):
        @pl.when(pl.program_id(1) == 0)
        def _init():
            h_ref[...] = jnp.zeros_like(h_ref)

        def body(i, carry):
            j = Lc - 1 - i
            h0 = arf[i] * h_ref[0] + brf[i]                  # row-major fwd
            h_ref[0] = h0
            yrf[i] = (crf[i] * h0).astype(yrf.dtype)
            h1 = acf[i] * h_ref[1] + bcf[i]                  # col-major fwd
            h_ref[1] = h1
            ycf[i] = (ccf[i] * h1).astype(ycf.dtype)
            h2 = arb[j] * h_ref[2] + brb[j]                  # row-major bwd
            h_ref[2] = h2
            yrb[j] = (crb[j] * h2).astype(yrb.dtype)
            h3 = acb[j] * h_ref[3] + bcb[j]                  # col-major bwd
            h_ref[3] = h3
            ycb[j] = (ccb[j] * h3).astype(ycb.dtype)
            return carry

        lax.fori_loop(0, Lc, body, 0)

    fwd_spec = pl.BlockSpec((None, Lc, tbt, D), lambda j, c: (0, c, j, 0))
    bwd_spec = pl.BlockSpec((None, Lc, tbt, D),
                            lambda j, c: (1, nchunks - 1 - c, j, 0))
    yf_spec = pl.BlockSpec((Lc, tbt, D), lambda j, c: (c, j, 0))
    yb_spec = pl.BlockSpec((Lc, tbt, D), lambda j, c: (nchunks - 1 - c, j, 0))
    out_sds = jax.ShapeDtypeStruct((L, TBp, D), jnp.float32)

    return pl.pallas_call(
        kernel,
        out_shape=(out_sds, out_sds, out_sds, out_sds),
        grid=(nj, nchunks),
        in_specs=[fwd_spec] * 6 + [bwd_spec] * 6,
        out_specs=(yf_spec, yf_spec, yb_spec, yb_spec),
        scratch_shapes=[pltpu.VMEM((4, tbt, D), jnp.float32)],
        compiler_params=_cparams("parallel", "arbitrary"),
    )(a_row, a_col, b_row, b_col, c_row, c_col,
      a_row, a_col, b_row, b_col, c_row, c_col)


# ------------------------------------ SS2D --------------------------------------

def ss2d_forward(x_nhwc, p, H, W):
    """SS2D 'v05_noz' (channel_first, d_state=1, ssm_ratio=1, d_conv=3)."""
    TB = x_nhwc.shape[0]
    D = x_nhwc.shape[-1]                  # d_inner == dim
    L = H * W
    rows = TB * L

    # in_proj (no bias) -> depthwise 3x3 (no bias) + SiLU (fused in dw kernel)
    x1_rows = matmul_bias(x_nhwc.reshape(rows, D), p["ssm_inproj_w"])
    x1 = dwconv3x3_silu(x1_rows.reshape(TB, H, W, D), p["ssm_dwconv_w"])
    x1r = x1.reshape(rows, D)

    # fused x_proj o dt_proj matmul + softplus/exp + delta*B*x + C broadcast
    a_cat, b_cat, c_cat = scan_precompute(x1r, p["w_all"], p["dt_bias_flat"],
                                          p["A_flat"])

    # pack into scan layout: per coefficient, one transpose per spatial ordering
    # (row-major HW and col-major WH); fwd/bwd share the ordering, the scan
    # kernel handles the reversal.
    # TODO(synk): fold these transposes into the precompute kernel's out_specs.
    tbt, TBp, Lc = _pick_scan_tiles(TB, L, D)

    def scan_layouts(t_cat):
        a = t_cat.reshape(TB, H, W, 4, D)
        row = jnp.transpose(a[:, :, :, 0:2, :], (3, 1, 2, 0, 4)).reshape(2, L, TB, D)
        col = jnp.transpose(a[:, :, :, 2:4, :], (3, 2, 1, 0, 4)).reshape(2, L, TB, D)
        return _pad_axis(row, 2, TBp), _pad_axis(col, 2, TBp)

    a_row, a_col = scan_layouts(a_cat)
    b_row, b_col = scan_layouts(b_cat)
    c_row, c_col = scan_layouts(c_cat)

    y_rf, y_cf, y_rb, y_cb = selective_scan(a_row, a_col, b_row, b_col,
                                            c_row, c_col, tbt, Lc)

    # cross-merge: every direction is already in forward spatial order; only the
    # column-major ordering needs the (W,H)->(H,W) reorder.
    y_row = (y_rf + y_rb)[:, :TB]                            # (L, TB, D) HW order
    y_col = (y_cf + y_cb)[:, :TB]                            # (L, TB, D) WH order
    y_col = jnp.transpose(y_col.reshape(W, H, TB, D), (1, 0, 2, 3)).reshape(L, TB, D)
    y_rows = jnp.transpose(y_row + y_col, (1, 0, 2)).reshape(rows, D)

    # + (sum_k D_k) * x, then out_norm (channel LayerNorm) + out_proj — fused
    out = ln_matmul(y_rows, p["outnorm_g"], p["outnorm_b"], p["outproj_w"],
                    extra=x1r, extra_scale=p["ds_sum"])
    return out.reshape(TB, H, W, D)


# ------------------------------------ model -------------------------------------

def spik_mamba_block(x, p):
    """Forward of SpikMambaBlock.  x: (T, B, C, H, W) float32."""
    T, B, C, H, W = x.shape
    TB = T * B
    rows = TB * H * W

    # channel-last working layout
    x_nhwc = jnp.transpose(x.reshape(TB, C, H, W), (0, 2, 3, 1))     # (TB,H,W,C)
    x_rows = x_nhwc.reshape(rows, C)

    # ---- norm1 fused with SpikeMamba.in_proj; xn1 is also the gate operand and
    #      the block residual (the reference reassigns x = norm1(x)) ----
    xproj_rows, xn1_rows = ln_matmul(
        x_rows, p["norm1_g"], p["norm1_b"], p["inproj_w"], p["inproj_b"],
        also_out_norm=True)

    # ---- snn_in: multi-step LIF over the leading T*B axis (as the reference
    #      calls it on a (T*B, C, H, W) tensor).  Spikes are exact in bf16. ----
    x_snn = lif_multistep(xproj_rows.reshape(TB, H * W * C),
                          out_dtype=jnp.bfloat16).reshape(TB, H, W, C)

    # ---- conv 3x3 (+bias) + SiLU: 9 accumulated full-block matmuls ----
    x_conv = conv3x3(x_snn, p["conv_w"], p["conv_b"], act="silu",
                     out_dtype=jnp.float32).reshape(TB, H, W, C)

    # ---- SS2D ----
    y_ssm = ss2d_forward(x_conv, p, H, W)                            # (TB,H,W,C)

    # ---- snn2 (LIF over T) fused with the gate (*xn1) and the residual (+xn1)
    x2_rows = lif_multistep(y_ssm.reshape(T, B * H * W * C),
                            gate=xn1_rows.reshape(T, B * H * W * C),
                            out_dtype=jnp.float32).reshape(rows, C)

    # ---- norm2 fused with FFN conv1 + SiLU (also emits xn2 for the residual);
    #      the hidden goes to the second 1x1 conv in bf16 (MXU operand) ----
    h1, xn2_rows = ln_matmul(
        x2_rows, p["norm2_g"], p["norm2_b"], p["ffn_w1"], p["ffn_b1"],
        act="silu", also_out_norm=True, out_dtype=jnp.bfloat16)
    # ---- FFN conv2 (+bias) fused with the final residual; the reference does
    #      x = norm2(x); x = ffn(x) + x  => the residual is the norm2 output ----
    out_rows = matmul_bias(h1, p["ffn_w2"], p["ffn_b2"], residual=xn2_rows,
                           out_dtype=x.dtype)

    out = out_rows.reshape(TB, H, W, C)
    return jnp.transpose(out, (0, 3, 1, 2)).reshape(T, B, C, H, W)


def init_params(key, dim, expansion=4, K=4):
    """Random parameters.  Scan direction order: [row-fwd, row-bwd, col-fwd,
    col-bwd] (A/dt_bias/D rows and the fused weight's column blocks share it)."""
    d_state = 1
    R = max(1, math.ceil(dim / 16))                       # dt_rank='auto'
    ks = jax.random.split(key, 12)

    def nrm(k, shape, scale=0.3):
        return (scale * jax.random.normal(k, shape)).astype(jnp.float32)

    # per-direction SSM projections; x_proj and dt_proj are composed (both are
    # per-position linear maps with nothing in between).
    xproj_w = nrm(ks[4], (K, dim, R + 2 * d_state))       # per-dir [dt_r | B | C]
    dtproj_w = nrm(ks[5], (K, R, dim), scale=0.5)
    w_dt = jnp.concatenate([xproj_w[k, :, :R] @ dtproj_w[k] for k in range(K)],
                           axis=1)                        # (dim, 4*dim)
    w_b = jnp.stack([xproj_w[k, :, R] for k in range(K)], axis=1)      # (dim, 4)
    w_c = jnp.stack([xproj_w[k, :, R + 1] for k in range(K)], axis=1)  # (dim, 4)
    w_all = jnp.concatenate([w_dt, w_b, w_c], axis=1)     # (dim, 4*dim + 8)

    A_log = jnp.zeros((K, dim), jnp.float32)     # 'v0' init, d_state=1 -> A = -1
    Ds = jnp.ones((K, dim), jnp.float32)
    dt_bias = 0.05 * jnp.ones((K, dim), jnp.float32)

    # conv_w[dy*3+dx, cin, cout] corresponds to torch Conv2d weight[cout,cin,dy,dx]
    return {
        "norm1_g": jnp.ones((dim,), jnp.float32),
        "norm1_b": jnp.zeros((dim,), jnp.float32),
        "inproj_w": nrm(ks[0], (dim, dim)),
        "inproj_b": jnp.zeros((dim,), jnp.float32),
        "conv_w": nrm(ks[1], (9, dim, dim), scale=0.2),
        "conv_b": jnp.zeros((dim,), jnp.float32),
        "ssm_inproj_w": nrm(ks[2], (dim, dim)),
        "ssm_dwconv_w": nrm(ks[3], (3, 3, dim)).reshape(9, 1, dim),
        "w_all": w_all,
        "dt_bias_flat": dt_bias.reshape(K * dim),
        "A_flat": (-jnp.exp(A_log)).reshape(K * dim),
        "ds_sum": Ds.sum(axis=0),
        "outnorm_g": jnp.ones((dim,), jnp.float32),
        "outnorm_b": jnp.zeros((dim,), jnp.float32),
        "outproj_w": nrm(ks[6], (dim, dim)),
        "norm2_g": jnp.ones((dim,), jnp.float32),
        "norm2_b": jnp.zeros((dim,), jnp.float32),
        "ffn_w1": nrm(ks[7], (dim, dim * expansion), scale=0.2),
        "ffn_b1": jnp.zeros((dim * expansion,), jnp.float32),
        "ffn_w2": nrm(ks[8], (dim * expansion, dim), scale=0.2),
        "ffn_b2": jnp.zeros((dim,), jnp.float32),
    }


if __name__ == "__main__":
    T, B, C, H, W = 4, 2, 8, 8, 8
    key = jax.random.PRNGKey(0)
    kx, kp = jax.random.split(key)
    x = jax.random.normal(kx, (T, B, C, H, W), dtype=jnp.float32)
    params = init_params(kp, C)

    out = jax.block_until_ready(spik_mamba_block(x, params))
    assert out.shape == (T, B, C, H, W)
    assert bool(jnp.all(jnp.isfinite(out)))
    print("KERNEL_OK")
</pallas_src>

<mosaic_0001>
module attributes {stable_mosaic.version = 11 : i64} {
  func.func @kernel(%arg0: i32, %arg1: memref<256x8xf32, #tpu.memory_space<vmem>>, %arg2: memref<1x8xf32, #tpu.memory_space<vmem>>, %arg3: memref<1x8xf32, #tpu.memory_space<vmem>>, %arg4: memref<8x8xbf16, #tpu.memory_space<vmem>>, %arg5: memref<1x8xf32, #tpu.memory_space<vmem>>, %arg6: memref<256x8xf32, #tpu.memory_space<vmem>>, %arg7: memref<256x8xf32, #tpu.memory_space<vmem>>) attributes {dimension_semantics = [#tpu.dimension_semantics<parallel>], iteration_bounds = array<i64: 2>, scalar_prefetch = 0 : i64, scratch_operands = 0 : i64, tpu.core_type = #tpu.core_type<tc>, window_params = [{transform_indices = @transform_0, window_bounds = array<i64: 256, 8>}, {pipeline_mode = #tpu.pipeline_mode<synchronous>, transform_indices = @transform_1, window_bounds = array<i64: 1, 8>}, {pipeline_mode = #tpu.pipeline_mode<synchronous>, transform_indices = @transform_2, window_bounds = array<i64: 1, 8>}, {pipeline_mode = #tpu.pipeline_mode<synchronous>, transform_indices = @transform_3, window_bounds = array<i64: 8, 8>}, {pipeline_mode = #tpu.pipeline_mode<synchronous>, transform_indices = @transform_4, window_bounds = array<i64: 1, 8>}, {transform_indices = @transform_5, window_bounds = array<i64: 256, 8>}, {transform_indices = @transform_6, window_bounds = array<i64: 256, 8>}]} {
    %c0 = arith.constant 0 : index
    %c0_0 = arith.constant 0 : index
    %0 = vector.load %arg1[%c0, %c0_0] : memref<256x8xf32, #tpu.memory_space<vmem>>, vector<256x8xf32>
    %cst = arith.constant dense<0.000000e+00> : vector<256xf32>
    %1 = vector.multi_reduction <add>, %0, %cst [1] : vector<256x8xf32> to vector<256xf32>
    %2 = vector.shape_cast %1 : vector<256xf32> to vector<256x1xf32>
    %cst_1 = arith.constant 8.000000e+00 : f32
    %3 = vector.broadcast %cst_1 : f32 to vector<256x1xf32>
    %4 = arith.divf %2, %3 : vector<256x1xf32>
    %5 = vector.broadcast %4 : vector<256x1xf32> to vector<256x8xf32>
    %6 = arith.subf %0, %5 : vector<256x8xf32>
    %7 = arith.mulf %6, %6 : vector<256x8xf32>
    %cst_2 = arith.constant dense<0.000000e+00> : vector<256xf32>
    %8 = vector.multi_reduction <add>, %7, %cst_2 [1] : vector<256x8xf32> to vector<256xf32>
    %9 = vector.shape_cast %8 : vector<256xf32> to vector<256x1xf32>
    %cst_3 = arith.constant 8.000000e+00 : f32
    %10 = vector.broadcast %cst_3 : f32 to vector<256x1xf32>
    %11 = arith.divf %9, %10 : vector<256x1xf32>
    %12 = vector.broadcast %4 : vector<256x1xf32> to vector<256x8xf32>
    %13 = arith.subf %0, %12 : vector<256x8xf32>
    %cst_4 = arith.constant 9.99999974E-6 : f32
    %14 = vector.broadcast %cst_4 : f32 to vector<256x1xf32>
    %15 = arith.addf %11, %14 : vector<256x1xf32>
    %16 = math.rsqrt %15 : vector<256x1xf32>
    %17 = vector.broadcast %16 : vector<256x1xf32> to vector<256x8xf32>
    %18 = arith.mulf %13, %17 : vector<256x8xf32>
    %c0_5 = arith.constant 0 : index
    %c0_6 = arith.constant 0 : index
    %19 = vector.load %arg2[%c0_5, %c0_6] : memref<1x8xf32, #tpu.memory_space<vmem>>, vector<1x8xf32>
    %20 = vector.broadcast %19 : vector<1x8xf32> to vector<256x8xf32>
    %21 = arith.mulf %18, %20 : vector<256x8xf32>
    %c0_7 = arith.constant 0 : index
    %c0_8 = arith.constant 0 : index
    %22 = vector.load %arg3[%c0_7, %c0_8] : memref<1x8xf32, #tpu.memory_space<vmem>>, vector<1x8xf32>
    %23 = vector.broadcast %22 : vector<1x8xf32> to vector<256x8xf32>
    %24 = arith.addf %21, %23 : vector<256x8xf32>
    %25 = arith.truncf %24 : vector<256x8xf32> to vector<256x8xbf16>
    %c0_9 = arith.constant 0 : index
    %c0_10 = arith.constant 0 : index
    %26 = vector.load %arg4[%c0_9, %c0_10] : memref<8x8xbf16, #tpu.memory_space<vmem>>, vector<8x8xbf16>
    %cst_11 = arith.constant dense<0.000000e+00> : vector<256x8xf32>
    %27 = tpu.matmul %25, %26, %cst_11 {dimension_numbers = #tpu.dot_dimension_numbers<[1], [0], [0], [1], [0, 0, 1, 1], [], []>} : vector<256x8xbf16>, vector<8x8xbf16>, vector<256x8xf32> -> vector<256x8xf32>
    %c0_12 = arith.constant 0 : index
    %c0_13 = arith.constant 0 : index
    %28 = vector.load %arg5[%c0_12, %c0_13] : memref<1x8xf32, #tpu.memory_space<vmem>>, vector<1x8xf32>
    %29 = vector.broadcast %28 : vector<1x8xf32> to vector<256x8xf32>
    %30 = arith.addf %27, %29 : vector<256x8xf32>
    %c0_14 = arith.constant 0 : index
    %c0_15 = arith.constant 0 : index
    %31 = vector.load %arg6[%c0_14, %c0_15] : memref<256x8xf32, #tpu.memory_space<vmem>>, vector<256x8xf32>
    tpu.vector_store %arg6[%c0_14, %c0_15], %30 {strides = array<i32>} : memref<256x8xf32, #tpu.memory_space<vmem>>, vector<256x8xf32>,
    %c0_16 = arith.constant 0 : index
    %c0_17 = arith.constant 0 : index
    %32 = vector.load %arg7[%c0_16, %c0_17] : memref<256x8xf32, #tpu.memory_space<vmem>>, vector<256x8xf32>
    tpu.vector_store %arg7[%c0_16, %c0_17], %24 {strides = array<i32>} : memref<256x8xf32, #tpu.memory_space<vmem>>, vector<256x8xf32>,
    return
  }
  func.func @transform_0(%arg0: i32) -> (i32, i32) {
    %c0_i32 = arith.constant 0 : i32
    %c0_i32_0 = arith.constant 0 : i32
    return %arg0, %c0_i32 : i32, i32
  }
  func.func @transform_1(%arg0: i32) -> (i32, i32) {
    %c0_i32 = arith.constant 0 : i32
    %c0_i32_0 = arith.constant 0 : i32
    %c0_i32_1 = arith.constant 0 : i32
    return %c0_i32, %c0_i32_0 : i32, i32
  }
  func.func @transform_2(%arg0: i32) -> (i32, i32) {
    %c0_i32 = arith.constant 0 : i32
    %c0_i32_0 = arith.constant 0 : i32
    %c0_i32_1 = arith.constant 0 : i32
    return %c0_i32, %c0_i32_0 : i32, i32
  }
  func.func @transform_3(%arg0: i32) -> (i32, i32) {
    %c0_i32 = arith.constant 0 : i32
    %c0_i32_0 = arith.constant 0 : i32
    %c0_i32_1 = arith.constant 0 : i32
    return %c0_i32, %c0_i32_0 : i32, i32
  }
  func.func @transform_4(%arg0: i32) -> (i32, i32) {
    %c0_i32 = arith.constant 0 : i32
    %c0_i32_0 = arith.constant 0 : i32
    %c0_i32_1 = arith.constant 0 : i32
    return %c0_i32, %c0_i32_0 : i32, i32
  }
  func.func @transform_5(%arg0: i32) -> (i32, i32) {
    %c0_i32 = arith.constant 0 : i32
    %c0_i32_0 = arith.constant 0 : i32
    return %arg0, %c0_i32 : i32, i32
  }
  func.func @transform_6(%arg0: i32) -> (i32, i32) {
    %c0_i32 = arith.constant 0 : i32
    %c0_i32_0 = arith.constant 0 : i32
    return %arg0, %c0_i32 : i32, i32
  }
}

</mosaic_0001>

<bundles_post_ra>
// kernel: tpu_custom_call.1
= control target key start
LH: loop header
LB: loop body
LE: loop exit
PB: predicated region body
PF: predicated region fallthrough
CT: control target
= control target key end

     0   :  { %s1391_s21 = smov 0   ;;  %s2064_s0 = inlined_call_operand.vmem [shape: f32[512,8], index: 0, kind: input, shape index: {}]   ;;  %s2065_s1 = inlined_call_operand.vmem [shape: f32[1,8], index: 1, kind: input, shape index: {}]   ;;  %s2066_s2 = inlined_call_operand.vmem [shape: f32[1,8], index: 2, kind: input, shape index: {}]   ;;  %s2067_s3 = inlined_call_operand.vmem [shape: bf16[8,8], index: 3, kind: input, shape index: {}]   ;;  %s2068_s4 = inlined_call_operand.vmem [shape: f32[1,8], index: 4, kind: input, shape index: {}]   ;;  %s2069_s5 = inlined_call_operand.vmem [shape: f32[512,8], index: 5, kind: output, shape index: {0}]   ;;  %s2070_s6 = inlined_call_operand.vmem [shape: f32[512,8], index: 6, kind: output, shape index: {1}]  }
   0x1 LB: > { %s1189_s22 = sadd.s32 4294967295, %s1354_s21   ;;  %p1193_p0 = scmp.ge.s32.totalorder %s1354_s21, 1  ;;  %s1354_s21 = sphi %s1391_s21, %s17_s21  }
   0x2   : > { %p216_p1 = scmp.lt.s32.totalorder %s1354_s21, 3 }
   0x4   : > { %p217_p2 = pnand %p1193_p0, %p216_p1 }
   0x5   : > { %s1194_s23 = sshll.u32 (!%p217_p2), %s1189_s22, 5  ;;  %vm302_vm0 = vcmask (!%p217_p2), 64512   ;;  %vm870_vm1 = vcmask (!%p217_p2), 1043456  }
   0x6   : > { %220 = sbr.rel (%p217_p2) target bundleno = 614 (0x266), region = 40  ;;  %p252_p3 = scmp.lt.s32.totalorder (!%p217_p2), %s1194_s23, 63 }
   0xd   : > { %s2072_s23 = smov (!%p252_p3, %s1194_s23), 63 }
   0xe   : > { %s1399_s24 = sshll.u32 %s2072_s23, 3 }
   0xf   : > { %s1405_s27 = scalar_lea.vmem %s2064_s0, %s1399_s24  ;;  %s1778_s12 = scalar_lea.vmem %s2070_s6, %s1399_s24 }
  0x10   : > { %v1408_v0 = vld [vmem:[%s1405_s27] sm:$0xff]  ;;  %v1414_v2 = vld [vmem:[%s1405_s27 + $0x8] sm:$0xff]  ;;  %v1428_v8 = vld [vmem:[%s1405_s27 + $0x10] sm:$0xff]  ;;  %s1963_s17 = scalar_lea.vmem %s2069_s5, %s1399_s24 }
  0x11   : > { %v1411_v1 = vld [vmem:[%s1405_s27 + $0x80] sm:$0xff]  ;;  %v303_v3 = vsel %vm302_vm0, %v1408_v0, 0.0  ;;  %v1421_v5 = vld [vmem:[%s1405_s27 + $0x88] sm:$0xff]  ;;  %v306_v6 = vsel %vm302_vm0, %v1414_v2, 0.0  ;;  %v1431_v9 = vld [vmem:[%s1405_s27 + $0x18] sm:$0xff]  ;;  %v309_v10 = vsel %vm302_vm0, %v1428_v8, 0.0 }
  0x12   : > { %v351_v4 = vsel %vm302_vm0, %v1411_v1, 0.0  ;;  %304 = vadd.xlane.f32.xlu0 %v303_v3  ;;  %v354_v7 = vsel %vm302_vm0, %v1421_v5, 0.0  ;;  %v312_v11 = vsel %vm302_vm0, %v1431_v9, 0.0  ;;  %v1438_v12 = vld [vmem:[%s1405_s27 + $0x90] sm:$0xff]  ;;  %v1441_v13 = vld [vmem:[%s1405_s27 + $0x98] sm:$0xff]  ;;  %v1448_v16 = vld [vmem:[%s1405_s27 + $0x20] sm:$0xff] }
  0x13   : > { %352 = vadd.xlane.f32.xlu1 %v351_v4  ;;  %v357_v14 = vsel %vm302_vm0, %v1438_v12, 0.0  ;;  %v360_v15 = vsel %vm302_vm0, %v1441_v13, 0.0  ;;  %v1451_v17 = vld [vmem:[%s1405_s27 + $0x28] sm:$0xff]  ;;  %v315_v18 = vsel %vm302_vm0, %v1448_v16, 0.0  ;;  %v1458_v20 = vld [vmem:[%s1405_s27 + $0xa0] sm:$0xff]  ;;  %v1468_v24 = vld [vmem:[%s1405_s27 + $0x30] sm:$0xff] }
  0x14   : > { %v318_v19 = vsel %vm302_vm0, %v1451_v17, 0.0  ;;  %v1461_v21 = vld [vmem:[%s1405_s27 + $0xa8] sm:$0xff]  ;;  %v363_v22 = vsel %vm302_vm0, %v1458_v20, 0.0  ;;  %v1471_v25 = vld [vmem:[%s1405_s27 + $0x38] sm:$0xff]  ;;  %v321_v26 = vsel %vm302_vm0, %v1468_v24, 0.0  ;;  %v1478_v28 = vld [vmem:[%s1405_s27 + $0xb0] sm:$0xff] }
  0x15   : > { %v366_v23 = vsel %vm302_vm0, %v1461_v21, 0.0  ;;  %v324_v27 = vsel %vm302_vm0, %v1471_v25, 0.0  ;;  %v1481_v29 = vld [vmem:[%s1405_s27 + $0xb8] sm:$0xff]  ;;  %v369_v30 = vsel %vm302_vm0, %v1478_v28, 0.0  ;;  %v1488_v32 = vld [vmem:[%s1405_s27 + $0x40] sm:$0xff]  ;;  %v1491_v33 = vld [vmem:[%s1405_s27 + $0x48] sm:$0xff] }
  0x16   : > { %307 = vadd.xlane.f32.xlu0 %v306_v6  ;;  %v372_v31 = vsel %vm302_vm0, %v1481_v29, 0.0  ;;  %v327_v34 = vsel %vm302_vm0, %v1488_v32, 0.0  ;;  %v330_v35 = vsel %vm302_vm0, %v1491_v33, 0.0  ;;  %v1498_v36 = vld [vmem:[%s1405_s27 + $0xc0] sm:$0xff]  ;;  %v1501_v37 = vld [vmem:[%s1405_s27 + $0xc8] sm:$0xff]  ;;  %v1508_v40 = vld [vmem:[%s1405_s27 + $0x50] sm:$0xff] }
  0x17   : > { %355 = vadd.xlane.f32.xlu1 %v354_v7  ;;  %v375_v38 = vsel %vm302_vm0, %v1498_v36, 0.0  ;;  %v378_v39 = vsel %vm302_vm0, %v1501_v37, 0.0  ;;  %v1511_v41 = vld [vmem:[%s1405_s27 + $0x58] sm:$0xff]  ;;  %v333_v42 = vsel %vm302_vm0, %v1508_v40, 0.0  ;;  %v1518_v44 = vld [vmem:[%s1405_s27 + $0xd0] sm:$0xff]  ;;  %v1528_v48 = vld [vmem:[%s1405_s27 + $0x60] sm:$0xff] }
  0x18   : > { %v336_v43 = vsel %vm302_vm0, %v1511_v41, 0.0  ;;  %v1521_v45 = vld [vmem:[%s1405_s27 + $0xd8] sm:$0xff]  ;;  %v381_v46 = vsel %vm302_vm0, %v1518_v44, 0.0  ;;  %v1531_v49 = vld [vmem:[%s1405_s27 + $0x68] sm:$0xff]  ;;  %v339_v50 = vsel %vm302_vm0, %v1528_v48, 0.0  ;;  %v1538_v52 = vld [vmem:[%s1405_s27 + $0xe0] sm:$0xff] }
  0x19   : > { %v384_v47 = vsel %vm302_vm0, %v1521_v45, 0.0  ;;  %v342_v51 = vsel %vm302_vm0, %v1531_v49, 0.0  ;;  %v1541_v53 = vld [vmem:[%s1405_s27 + $0xe8] sm:$0xff]  ;;  %v387_v54 = vsel %vm302_vm0, %v1538_v52, 0.0  ;;  %v1548_v56 = vld [vmem:[%s1405_s27 + $0x70] sm:$0xff]  ;;  %v1551_v57 = vld [vmem:[%s1405_s27 + $0x78] sm:$0xff] }
  0x1a   : > { %310 = vadd.xlane.f32.xlu0 %v309_v10  ;;  %v390_v55 = vsel %vm302_vm0, %v1541_v53, 0.0  ;;  %v345_v58 = vsel %vm302_vm0, %v1548_v56, 0.0  ;;  %v348_v59 = vsel %vm302_vm0, %v1551_v57, 0.0  ;;  %v1558_v60 = vld [vmem:[%s1405_s27 + $0xf0] sm:$0xff]  ;;  %v1561_v61 = vld [vmem:[%s1405_s27 + $0xf8] sm:$0xff] }
  0x1b   : > { %313 = vadd.xlane.f32.xlu1 %v312_v11  ;;  %v393_v62 = vsel %vm302_vm0, %v1558_v60, 0.0  ;;  %v396_v63 = vsel %vm302_vm0, %v1561_v61, 0.0 }
  0x1e   : > { %358 = vadd.xlane.f32.xlu0 %v357_v14 }
  0x1f   : > { %361 = vadd.xlane.f32.xlu1 %v360_v15 }
  0x22   : > { %316 = vadd.xlane.f32.xlu0 %v315_v18 }
  0x23   : > { %319 = vadd.xlane.f32.xlu1 %v318_v19 }
  0x26   : > { %364 = vadd.xlane.f32.xlu0 %v363_v22 }
  0x27   : > { %367 = vadd.xlane.f32.xlu1 %v366_v23 }
  0x2a   : > { %322 = vadd.xlane.f32.xlu0 %v321_v26 }
  0x2b   : > { %325 = vadd.xlane.f32.xlu1 %v324_v27 }
  0x2e   : > { %370 = vadd.xlane.f32.xlu0 %v369_v30 }
  0x2f   : > { %373 = vadd.xlane.f32.xlu1 %v372_v31 }
  0x32   : > { %328 = vadd.xlane.f32.xlu0 %v327_v34 }
  0x33   : > { %331 = vadd.xlane.f32.xlu1 %v330_v35 }
  0x36   : > { %376 = vadd.xlane.f32.xlu0 %v375_v38 }
  0x37   : > { %379 = vadd.xlane.f32.xlu1 %v378_v39 }
  0x3a   : > { %334 = vadd.xlane.f32.xlu0 %v333_v42 }
  0x3b   : > { %337 = vadd.xlane.f32.xlu1 %v336_v43 }
  0x3e   : > { %382 = vadd.xlane.f32.xlu0 %v381_v46 }
  0x3f   : > { %385 = vadd.xlane.f32.xlu1 %v384_v47 }
  0x42   : > { %340 = vadd.xlane.f32.xlu0 %v339_v50 }
  0x43   : > { %343 = vadd.xlane.f32.xlu1 %v342_v51 }
  0x46   : > { %388 = vadd.xlane.f32.xlu0 %v387_v54 }
  0x47   : > { %391 = vadd.xlane.f32.xlu1 %v390_v55 }
  0x4a   : > { %346 = vadd.xlane.f32.xlu0 %v345_v58 }
  0x4b   : > { %349 = vadd.xlane.f32.xlu1 %v348_v59 }
  0x4e   : > { %394 = vadd.xlane.f32.xlu0 %v393_v62 }
  0x4f   : > { %397 = vadd.xlane.f32.xlu1 %v396_v63 }
  0x9f   : > { %v305_v3 = vpop.xlane.xlu0 %304 }
  0xa0   : > { %v353_v4 = vpop.xlane.xlu1 %352  ;;  %v400_v6 = vmul.f32 0.125, %v305_v3 }
  0xa1   : > { %v416_v7 = vmul.f32 0.125, %v353_v4 }
  0xa2   : > { %v1568_v10 = vsub.f32 %v1408_v0, %v400_v6 }
  0xa3   : > { %v1571_v11 = vsub.f32 %v1411_v1, %v416_v7  ;;  %v308_v14 = vpop.xlane.xlu0 %307 }
  0xa4   : > { %v356_v15 = vpop.xlane.xlu1 %355  ;;  %v401_v18 = vmul.f32 0.125, %v308_v14  ;;  %v464_v22 = vmul.f32 %v1568_v10, %v1568_v10 }
  0xa5   : > { %v417_v19 = vmul.f32 0.125, %v356_v15  ;;  %v480_v23 = vmul.f32 %v1571_v11, %v1571_v11 }
  0xa6   : > { %v1578_v26 = vsub.f32 %v1414_v2, %v401_v18  ;;  %v496_v0 = vsel %vm302_vm0, %v464_v22, 0.0 }
  0xa7   : > { %v1581_v27 = vsub.f32 %v1421_v5, %v417_v19  ;;  %497 = vadd.xlane.f32.xlu0 %v496_v0  ;;  %v311_v1 = vpop.xlane.xlu0 %310  ;;  %v544_v31 = vsel %vm302_vm0, %v480_v23, 0.0 }
  0xa8   : > { %v314_v30 = vpop.xlane.xlu1 %313  ;;  %v402_v34 = vmul.f32 0.125, %v311_v1  ;;  %v465_v38 = vmul.f32 %v1578_v26, %v1578_v26 }
  0xa9   : > { %v403_v35 = vmul.f32 0.125, %v314_v30  ;;  %v481_v39 = vmul.f32 %v1581_v27, %v1581_v27 }
  0xaa   : > { %v1590_v2 = vsub.f32 %v1428_v8, %v402_v34  ;;  %v499_v42 = vsel %vm302_vm0, %v465_v38, 0.0 }
  0xab   : > { %v1593_v5 = vsub.f32 %v1431_v9, %v403_v35  ;;  %545 = vadd.xlane.f32.xlu0 %v544_v31  ;;  %500 = vadd.xlane.f32.xlu1 %v499_v42  ;;  %v359_v43 = vpop.xlane.xlu0 %358  ;;  %v547_v47 = vsel %vm302_vm0, %v481_v39, 0.0 }
  0xac   : > { %v362_v46 = vpop.xlane.xlu1 %361  ;;  %v418_v50 = vmul.f32 0.125, %v359_v43  ;;  %v466_v54 = vmul.f32 %v1590_v2, %v1590_v2 }
  0xad   : > { %v419_v51 = vmul.f32 0.125, %v362_v46  ;;  %v467_v8 = vmul.f32 %v1593_v5, %v1593_v5 }
  0xae   : > { %v1602_v55 = vsub.f32 %v1438_v12, %v418_v50  ;;  %v502_v58 = vsel %vm302_vm0, %v466_v54, 0.0 }
  0xaf   : > { %v1605_v9 = vsub.f32 %v1441_v13, %v419_v51  ;;  %548 = vadd.xlane.f32.xlu1 %v547_v47  ;;  %503 = vadd.xlane.f32.xlu0 %v502_v58  ;;  %v317_v59 = vpop.xlane.xlu0 %316  ;;  %v505_v63 = vsel %vm302_vm0, %v467_v8, 0.0 }
  0xb0   : > { %v320_v62 = vpop.xlane.xlu1 %319  ;;  %v404_v3 = vmul.f32 0.125, %v317_v59  ;;  %v482_v6 = vmul.f32 %v1602_v55, %v1602_v55 }
  0xb1   : > { %v405_v4 = vmul.f32 0.125, %v320_v62  ;;  %v483_v12 = vmul.f32 %v1605_v9, %v1605_v9 }
  0xb2   : > { %v1614_v7 = vsub.f32 %v1448_v16, %v404_v3  ;;  %v550_v14 = vsel %vm302_vm0, %v482_v6, 0.0 }
  0xb3   : > { %v1617_v13 = vsub.f32 %v1451_v17, %v405_v4  ;;  %506 = vadd.xlane.f32.xlu1 %v505_v63  ;;  %551 = vadd.xlane.f32.xlu0 %v550_v14  ;;  %v365_v15 = vpop.xlane.xlu0 %364  ;;  %v553_v19 = vsel %vm302_vm0, %v483_v12, 0.0 }
  0xb4   : > { %v368_v18 = vpop.xlane.xlu1 %367  ;;  %v420_v22 = vmul.f32 0.125, %v365_v15  ;;  %v468_v0 = vmul.f32 %v1614_v7, %v1614_v7 }
  0xb5   : > { %v421_v23 = vmul.f32 0.125, %v368_v18  ;;  %v469_v16 = vmul.f32 %v1617_v13, %v1617_v13 }
  0xb6   : > { %v1626_v1 = vsub.f32 %v1458_v20, %v420_v22  ;;  %v508_v30 = vsel %vm302_vm0, %v468_v0, 0.0 }
  0xb7   : > { %v1629_v17 = vsub.f32 %v1461_v21, %v421_v23  ;;  %554 = vadd.xlane.f32.xlu1 %v553_v19  ;;  %509 = vadd.xlane.f32.xlu0 %v508_v30  ;;  %v323_v31 = vpop.xlane.xlu0 %322  ;;  %v511_v35 = vsel %vm302_vm0, %v469_v16, 0.0 }
  0xb8   : > { %v326_v34 = vpop.xlane.xlu1 %325  ;;  %v406_v38 = vmul.f32 0.125, %v323_v31  ;;  %v484_v42 = vmul.f32 %v1626_v1, %v1626_v1 }
  0xb9   : > { %v407_v39 = vmul.f32 0.125, %v326_v34  ;;  %v485_v20 = vmul.f32 %v1629_v17, %v1629_v17 }
  0xba   : > { %v1638_v43 = vsub.f32 %v1468_v24, %v406_v38  ;;  %v556_v46 = vsel %vm302_vm0, %v484_v42, 0.0 }
  0xbb   : > { %v1641_v21 = vsub.f32 %v1471_v25, %v407_v39  ;;  %512 = vadd.xlane.f32.xlu1 %v511_v35  ;;  %557 = vadd.xlane.f32.xlu0 %v556_v46  ;;  %v371_v47 = vpop.xlane.xlu0 %370  ;;  %v559_v51 = vsel %vm302_vm0, %v485_v20, 0.0 }
  0xbc   : > { %v374_v50 = vpop.xlane.xlu1 %373  ;;  %v422_v54 = vmul.f32 0.125, %v371_v47  ;;  %v470_v58 = vmul.f32 %v1638_v43, %v1638_v43 }
  0xbd   : > { %v423_v8 = vmul.f32 0.125, %v374_v50  ;;  %v471_v24 = vmul.f32 %v1641_v21, %v1641_v21 }
  0xbe   : > { %v1650_v59 = vsub.f32 %v1478_v28, %v422_v54  ;;  %v514_v62 = vsel %vm302_vm0, %v470_v58, 0.0 }
  0xbf   : > { %v1653_v25 = vsub.f32 %v1481_v29, %v423_v8  ;;  %560 = vadd.xlane.f32.xlu1 %v559_v51  ;;  %515 = vadd.xlane.f32.xlu0 %v514_v62  ;;  %v329_v63 = vpop.xlane.xlu0 %328  ;;  %v517_v4 = vsel %vm302_vm0, %v471_v24, 0.0 }
  0xc0   : > { %v332_v3 = vpop.xlane.xlu1 %331  ;;  %v408_v6 = vmul.f32 0.125, %v329_v63  ;;  %v486_v14 = vmul.f32 %v1650_v59, %v1650_v59 }
  0xc1   : > { %v409_v12 = vmul.f32 0.125, %v332_v3  ;;  %v487_v28 = vmul.f32 %v1653_v25, %v1653_v25 }
  0xc2   : > { %v1662_v15 = vsub.f32 %v1488_v32, %v408_v6  ;;  %v562_v18 = vsel %vm302_vm0, %v486_v14, 0.0 }
  0xc3   : > { %v1665_v29 = vsub.f32 %v1491_v33, %v409_v12  ;;  %518 = vadd.xlane.f32.xlu1 %v517_v4  ;;  %563 = vadd.xlane.f32.xlu0 %v562_v18  ;;  %v377_v19 = vpop.xlane.xlu0 %376  ;;  %v565_v23 = vsel %vm302_vm0, %v487_v28, 0.0 }
  0xc4   : > { %v380_v22 = vpop.xlane.xlu1 %379  ;;  %v424_v0 = vmul.f32 0.125, %v377_v19  ;;  %v472_v30 = vmul.f32 %v1662_v15, %v1662_v15 }
  0xc5   : > { %v425_v16 = vmul.f32 0.125, %v380_v22  ;;  %v473_v32 = vmul.f32 %v1665_v29, %v1665_v29 }
  0xc6   : > { %v1674_v31 = vsub.f32 %v1498_v36, %v424_v0  ;;  %v520_v34 = vsel %vm302_vm0, %v472_v30, 0.0 }
  0xc7   : > { %v1677_v33 = vsub.f32 %v1501_v37, %v425_v16  ;;  %566 = vadd.xlane.f32.xlu1 %v565_v23  ;;  %521 = vadd.xlane.f32.xlu0 %v520_v34  ;;  %v335_v35 = vpop.xlane.xlu0 %334  ;;  %v523_v39 = vsel %vm302_vm0, %v473_v32, 0.0 }
  0xc8   : > { %v338_v38 = vpop.xlane.xlu1 %337  ;;  %v410_v42 = vmul.f32 0.125, %v335_v35  ;;  %v488_v46 = vmul.f32 %v1674_v31, %v1674_v31 }
  0xc9   : > { %v411_v20 = vmul.f32 0.125, %v338_v38  ;;  %v489_v36 = vmul.f32 %v1677_v33, %v1677_v33 }
  0xca   : > { %v1686_v47 = vsub.f32 %v1508_v40, %v410_v42  ;;  %v568_v50 = vsel %vm302_vm0, %v488_v46, 0.0 }
  0xcb   : > { %v1689_v37 = vsub.f32 %v1511_v41, %v411_v20  ;;  %524 = vadd.xlane.f32.xlu1 %v523_v39  ;;  %569 = vadd.xlane.f32.xlu0 %v568_v50  ;;  %v383_v51 = vpop.xlane.xlu0 %382  ;;  %v571_v8 = vsel %vm302_vm0, %v489_v36, 0.0 }
  0xcc   : > { %v386_v54 = vpop.xlane.xlu1 %385  ;;  %v426_v58 = vmul.f32 0.125, %v383_v51  ;;  %v474_v62 = vmul.f32 %v1686_v47, %v1686_v47 }
  0xcd   : > { %v427_v24 = vmul.f32 0.125, %v386_v54  ;;  %v475_v40 = vmul.f32 %v1689_v37, %v1689_v37 }
  0xce   : > { %v1698_v63 = vsub.f32 %v1518_v44, %v426_v58  ;;  %v526_v3 = vsel %vm302_vm0, %v474_v62, 0.0 }
  0xcf   : > { %v1701_v41 = vsub.f32 %v1521_v45, %v427_v24  ;;  %572 = vadd.xlane.f32.xlu1 %v571_v8  ;;  %527 = vadd.xlane.f32.xlu0 %v526_v3  ;;  %v341_v4 = vpop.xlane.xlu0 %340  ;;  %v529_v12 = vsel %vm302_vm0, %v475_v40, 0.0 }
  0xd0   : > { %v344_v6 = vpop.xlane.xlu1 %343  ;;  %v412_v14 = vmul.f32 0.125, %v341_v4  ;;  %v490_v18 = vmul.f32 %v1698_v63, %v1698_v63 }
  0xd1   : > { %v413_v28 = vmul.f32 0.125, %v344_v6  ;;  %v491_v44 = vmul.f32 %v1701_v41, %v1701_v41 }
  0xd2   : > { %v1710_v19 = vsub.f32 %v1528_v48, %v412_v14  ;;  %v574_v22 = vsel %vm302_vm0, %v490_v18, 0.0 }
  0xd3   : > { %v1713_v45 = vsub.f32 %v1531_v49, %v413_v28  ;;  %530 = vadd.xlane.f32.xlu1 %v529_v12  ;;  %575 = vadd.xlane.f32.xlu0 %v574_v22  ;;  %v389_v23 = vpop.xlane.xlu0 %388  ;;  %v577_v16 = vsel %vm302_vm0, %v491_v44, 0.0  ;;  %v814_v49 = vld [vmem:[%s2067_s3] sm:$0xf] }
  0xd4   : > { %v392_v0 = vpop.xlane.xlu1 %391  ;;  %v428_v30 = vmul.f32 0.125, %v389_v23  ;;  %v476_v34 = vmul.f32 %v1710_v19, %v1710_v19  ;;  %1274 = vmatprep.subr.msk.bf16.mxu0 %vm870_vm1, %v814_v49  ;;  %1275 = vmatprep.subr.msk.bf16.mxu1 %vm870_vm1, %v814_v49  ;;  %v872_v36 = vsel %vm870_vm1, %v814_v49, 0 }
  0xd5   : > { %v429_v32 = vmul.f32 0.125, %v392_v0  ;;  %v477_v48 = vmul.f32 %v1713_v45, %v1713_v45  ;;  %1239 = vmatpush3.bf16.msra.mxu0 %v872_v36  ;;  %1273 = vmatpush3.bf16.msra.mxu1 %v872_v36 }
  0xd6   : > { %v1725_v35 = vsub.f32 %v1538_v52, %v428_v30  ;;  %v532_v39 = vsel %vm302_vm0, %v476_v34, 0.0 }
  0xd7   : > { %v1728_v38 = vsub.f32 %v1541_v53, %v429_v32  ;;  %578 = vadd.xlane.f32.xlu1 %v577_v16  ;;  %533 = vadd.xlane.f32.xlu0 %v532_v39  ;;  %v347_v42 = vpop.xlane.xlu0 %346  ;;  %v535_v46 = vsel %vm302_vm0, %v477_v48, 0.0 }
  0xd8   : > { %v350_v20 = vpop.xlane.xlu1 %349  ;;  %v414_v50 = vmul.f32 0.125, %v347_v42  ;;  %v492_v52 = vmul.f32 %v1725_v35, %v1725_v35 }
  0xd9   : > { %v415_v51 = vmul.f32 0.125, %v350_v20  ;;  %v493_v53 = vmul.f32 %v1728_v38, %v1728_v38 }
  0xda   : > { %v1737_v54 = vsub.f32 %v1548_v56, %v414_v50  ;;  %v580_v58 = vsel %vm302_vm0, %v492_v52, 0.0 }
  0xdb   : > { %v1740_v8 = vsub.f32 %v1551_v57, %v415_v51  ;;  %536 = vadd.xlane.f32.xlu1 %v535_v46  ;;  %581 = vadd.xlane.f32.xlu0 %v580_v58  ;;  %v395_v24 = vpop.xlane.xlu0 %394  ;;  %v583_v40 = vsel %vm302_vm0, %v493_v53, 0.0 }
  0xdc   : > { %v398_v62 = vpop.xlane.xlu1 %397  ;;  %v430_v3 = vmul.f32 0.125, %v395_v24  ;;  %v478_v6 = vmul.f32 %v1737_v54, %v1737_v54 }
  0xdd   : > { %v431_v4 = vmul.f32 0.125, %v398_v62  ;;  %v479_v56 = vmul.f32 %v1740_v8, %v1740_v8 }
  0xde   : > { %v1749_v12 = vsub.f32 %v1558_v60, %v430_v3  ;;  %v538_v14 = vsel %vm302_vm0, %v478_v6, 0.0  ;;  %v1765_v3 = vld [vmem:[%s2065_s1] ss:$0 sm:$0xff] }
  0xdf   : > { %v1752_v57 = vsub.f32 %v1561_v61, %v431_v4  ;;  %584 = vadd.xlane.f32.xlu1 %v583_v40  ;;  %539 = vadd.xlane.f32.xlu0 %v538_v14  ;;  %v541_v28 = vsel %vm302_vm0, %v479_v56, 0.0 }
  0xe0   : > { %v494_v18 = vmul.f32 %v1749_v12, %v1749_v12 }
  0xe1   : > { %v495_v44 = vmul.f32 %v1752_v57, %v1752_v57 }
  0xe2   : > { %v586_v22 = vsel %vm302_vm0, %v494_v18, 0.0  ;;  %v1771_v18 = vld [vmem:[%s2066_s2] ss:$0 sm:$0xff] }
  0xe3   : > { %542 = vadd.xlane.f32.xlu1 %v541_v28  ;;  %587 = vadd.xlane.f32.xlu0 %v586_v22  ;;  %v589_v60 = vsel %vm302_vm0, %v495_v44, 0.0 }
  0xe7   : > { %590 = vadd.xlane.f32.xlu1 %v589_v60 }
 0x134   : > { %v498_v61 = vpop.xlane.xlu0 %497 }
 0x135   : > { %v592_v23 = vmul.f32 0.125, %v498_v61 }
 0x137   : > { %v624_v0 = vadd.f32 1e-05, %v592_v23 }
 0x138   : > { %v501_v16 = vpop.xlane.xlu1 %500  ;;  %v546_v30 = vpop.xlane.xlu0 %545 }
 0x139   : > { %1284 = vrsqrt.f32 %v624_v0  ;;  %v593_v32 = vmul.f32 0.125, %v501_v16  ;;  %v608_v34 = vmul.f32 0.125, %v546_v30 }
 0x13b   : > { %v625_v48 = vadd.f32 1e-05, %v593_v32  ;;  %v640_v49 = vadd.f32 1e-05, %v608_v34 }
 0x13c   : > { %v549_v39 = vpop.xlane.xlu1 %548  ;;  %v504_v42 = vpop.xlane.xlu0 %503 }
 0x13d   : > { %1286 = vrsqrt.f32 %v625_v48  ;;  %v609_v20 = vmul.f32 0.125, %v549_v39  ;;  %v594_v46 = vmul.f32 0.125, %v504_v42 }
 0x13e   : > { %1288 = vrsqrt.f32 %v640_v49 }
 0x13f   : > { %v641_v36 = vadd.f32 1e-05, %v609_v20  ;;  %v626_v50 = vadd.f32 1e-05, %v594_v46 }
 0x140   : > { %v507_v51 = vpop.xlane.xlu1 %506  ;;  %v552_v52 = vpop.xlane.xlu0 %551 }
 0x141   : > { %1290 = vrsqrt.f32 %v641_v36  ;;  %v595_v53 = vmul.f32 0.125, %v507_v51  ;;  %v610_v58 = vmul.f32 0.125, %v552_v52 }
 0x142   : > { %1292 = vrsqrt.f32 %v626_v50 }
 0x143   : > { %v1285_v24 = vpop.eup %1284  ;;  %v627_v62 = vadd.f32 1e-05, %v595_v53  ;;  %v642_v40 = vadd.f32 1e-05, %v610_v58 }
 0x144   : > { %v555_v4 = vpop.xlane.xlu1 %554  ;;  %v510_v6 = vpop.xlane.xlu0 %509  ;;  %v688_v56 = vmul.f32 %v1285_v24, %v1568_v10 }
 0x145   : > { %1294 = vrsqrt.f32 %v627_v62  ;;  %v611_v14 = vmul.f32 0.125, %v555_v4  ;;  %v596_v28 = vmul.f32 0.125, %v510_v6 }
 0x146   : > { %1296 = vrsqrt.f32 %v642_v40  ;;  %v727_v44 = vmul.f32 %v1765_v3, %v688_v56 }
 0x147   : > { %v1287_v22 = vpop.eup %1286  ;;  %v643_v60 = vadd.f32 1e-05, %v611_v14  ;;  %v628_v10 = vadd.f32 1e-05, %v596_v28 }
 0x148   : > { %v1289_v61 = vpop.eup %1288  ;;  %v513_v23 = vpop.xlane.xlu1 %512  ;;  %v689_v16 = vmul.f32 %v1287_v22, %v1578_v26  ;;  %v766_v30 = vadd.f32 %v1771_v18, %v727_v44 }
 0x149   : > { %v558_v0 = vpop.xlane.xlu0 %557  ;;  %1298 = vrsqrt.f32 %v643_v60  ;;  %v597_v32 = vmul.f32 0.125, %v513_v23  ;;  %v704_v48 = vmul.f32 %v1289_v61, %v1571_v11 }
 0x14a   : > { %v612_v34 = vmul.f32 0.125, %v558_v0  ;;  %1300 = vrsqrt.f32 %v628_v10  ;;  %v728_v49 = vmul.f32 %v1765_v3, %v689_v16  ;;  %1067 = vst.msk [vmem:[%s1778_s12] sm:$0xff] %vm302_vm0, %v766_v30 }
 0x14b   : > { %v1291_v39 = vpop.eup %1290  ;;  %v629_v42 = vadd.f32 1e-05, %v597_v32  ;;  %v743_v46 = vmul.f32 %v1765_v3, %v704_v48 }
 0x14c   : > { %v644_v20 = vadd.f32 1e-05, %v612_v34  ;;  %v1293_v36 = vpop.eup %1292  ;;  %v561_v26 = vpop.xlane.xlu1 %560  ;;  %v767_v51 = vadd.f32 %v1771_v18, %v728_v49  ;;  %v705_v52 = vmul.f32 %v1291_v39, %v1581_v27 }
 0x14d   : > { %v516_v50 = vpop.xlane.xlu0 %515  ;;  %v690_v11 = vmul.f32 %v1293_v36, %v1590_v2  ;;  %1302 = vrsqrt.f32 %v629_v42  ;;  %v613_v53 = vmul.f32 0.125, %v561_v26  ;;  %v782_v40 = vadd.f32 %v1771_v18, %v743_v46 }
 0x14e   : > { %v598_v58 = vmul.f32 0.125, %v516_v50  ;;  %1304 = vrsqrt.f32 %v644_v20  ;;  %v798_v24 = vpack.c.bf16 %v767_v51, %v766_v30  ;;  %1068 = vst.msk [vmem:[%s1778_s12 + $0x8] sm:$0xff] %vm302_vm0, %v767_v51  ;;  %v744_v62 = vmul.f32 %v1765_v3, %v705_v52 }
 0x14f   : > { %v1295_v4 = vpop.eup %1294  ;;  %v645_v6 = vadd.f32 1e-05, %v613_v53  ;;  %v729_v27 = vmul.f32 %v1765_v3, %v690_v11  ;;  %1083 = vst.msk [vmem:[%s1778_s12 + $0x80] sm:$0xff] %vm302_vm0, %v782_v40 }
 0x150   : > { %v630_v56 = vadd.f32 1e-05, %v598_v58  ;;  %v1297_v14 = vpop.eup %1296  ;;  %v691_v2 = vmul.f32 %v1295_v4, %v1593_v5  ;;  %v519_v28 = vpop.xlane.xlu1 %518  ;;  %1240 = vmatprep.mubr.msk.bf16.mxu0 %vm302_vm0, %v798_v24  ;;  %v783_v22 = vadd.f32 %v1771_v18, %v744_v62 }
 0x151   : > { %v564_v44 = vpop.xlane.xlu0 %563  ;;  %v706_v60 = vmul.f32 %v1297_v14, %v1602_v55  ;;  %1306 = vrsqrt.f32 %v645_v6  ;;  %v599_v10 = vmul.f32 0.125, %v519_v28  ;;  %v768_v0 = vadd.f32 %v1771_v18, %v729_v27 }
 0x152   : > { %v614_v61 = vmul.f32 0.125, %v564_v44  ;;  %1308 = vrsqrt.f32 %v630_v56  ;;  %v806_v23 = vpack.c.bf16 %v783_v22, %v782_v40  ;;  %1084 = vst.msk [vmem:[%s1778_s12 + $0x88] sm:$0xff] %vm302_vm0, %v783_v22  ;;  %v730_v5 = vmul.f32 %v1765_v3, %v691_v2 }
 0x153   : > { %v1299_v16 = vpop.eup %1298  ;;  %v631_v30 = vadd.f32 1e-05, %v599_v10  ;;  %v745_v34 = vmul.f32 %v1765_v3, %v706_v60  ;;  %1069 = vst.msk [vmem:[%s1778_s12 + $0x10] sm:$0xff] %vm302_vm0, %v768_v0 }
 0x154   : > { %v646_v32 = vadd.f32 1e-05, %v614_v61  ;;  %v1301_v48 = vpop.eup %1300  ;;  %v707_v55 = vmul.f32 %v1299_v16, %v1605_v9  ;;  %v567_v49 = vpop.xlane.xlu1 %566  ;;  %1256 = vmatprep.mubr.msk.bf16.mxu1 %vm302_vm0, %v806_v23  ;;  %v769_v42 = vadd.f32 %v1771_v18, %v730_v5 }
 0x155   : > { %v522_v39 = vpop.xlane.xlu0 %521  ;;  %v692_v20 = vmul.f32 %v1301_v48, %v1614_v7  ;;  %1310 = vrsqrt.f32 %v631_v30  ;;  %v615_v46 = vmul.f32 0.125, %v567_v49  ;;  %v784_v50 = vadd.f32 %v1771_v18, %v745_v34 }
 0x156   : > { %v600_v36 = vmul.f32 0.125, %v522_v39  ;;  %1312 = vrsqrt.f32 %v646_v32  ;;  %v799_v26 = vpack.c.bf16 %v769_v42, %v768_v0  ;;  %1070 = vst.msk [vmem:[%s1778_s12 + $0x18] sm:$0xff] %vm302_vm0, %v769_v42  ;;  %v746_v9 = vmul.f32 %v1765_v3, %v707_v55 }
 0x157   : > { %v1303_v51 = vpop.eup %1302  ;;  %v647_v52 = vadd.f32 1e-05, %v615_v46  ;;  %v731_v53 = vmul.f32 %v1765_v3, %v692_v20  ;;  %1085 = vst.msk [vmem:[%s1778_s12 + $0x90] sm:$0xff] %vm302_vm0, %v784_v50 }
 0x158   : > { %v632_v11 = vadd.f32 1e-05, %v600_v36  ;;  %v1305_v58 = vpop.eup %1304  ;;  %v693_v7 = vmul.f32 %v1303_v51, %v1617_v13  ;;  %v525_v24 = vpop.xlane.xlu1 %524  ;;  %1241 = vmatmul.mubr.msk.bf16.vlgmr.msra.gmra.mrb[0].mxu0 %vm302_vm0, %v799_v26  ;;  %v785_v40 = vadd.f32 %v1771_v18, %v746_v9 }
 0x159   : > { %v570_v62 = vpop.xlane.xlu0 %569  ;;  %v708_v4 = vmul.f32 %v1305_v58, %v1626_v1  ;;  %1314 = vrsqrt.f32 %v647_v52  ;;  %v601_v6 = vmul.f32 0.125, %v525_v24  ;;  %v770_v14 = vadd.f32 %v1771_v18, %v731_v53 }
 0x15a   : > { %v616_v56 = vmul.f32 0.125, %v570_v62  ;;  %1316 = vrsqrt.f32 %v632_v11  ;;  %v807_v27 = vpack.c.bf16 %v785_v40, %v784_v50  ;;  %1086 = vst.msk [vmem:[%s1778_s12 + $0x98] sm:$0xff] %vm302_vm0, %v785_v40  ;;  %v732_v13 = vmul.f32 %v1765_v3, %v693_v7 }
 0x15b   : > { %v1307_v2 = vpop.eup %1306  ;;  %v633_v28 = vadd.f32 1e-05, %v601_v6  ;;  %v747_v22 = vmul.f32 %v1765_v3, %v708_v4  ;;  %1071 = vst.msk [vmem:[%s1778_s12 + $0x20] sm:$0xff] %vm302_vm0, %v770_v14 }
 0x15c   : > { %v648_v44 = vadd.f32 1e-05, %v616_v56  ;;  %v1309_v60 = vpop.eup %1308  ;;  %v709_v1 = vmul.f32 %v1307_v2, %v1629_v17  ;;  %v573_v10 = vpop.xlane.xlu1 %572  ;;  %1257 = vmatmul.mubr.msk.bf16.vlgmr.msra.gmra.mrb[0].mxu1 %vm302_vm0, %v807_v27  ;;  %v771_v23 = vadd.f32 %v1771_v18, %v732_v13 }
 0x15d   : > { %v528_v61 = vpop.xlane.xlu0 %527  ;;  %v694_v5 = vmul.f32 %v1309_v60, %v1638_v43  ;;  %1318 = vrsqrt.f32 %v633_v28  ;;  %v617_v0 = vmul.f32 0.125, %v573_v10  ;;  %v786_v32 = vadd.f32 %v1771_v18, %v747_v22 }
 0x15e   : > { %v602_v16 = vmul.f32 0.125, %v528_v61  ;;  %1320 = vrsqrt.f32 %v648_v44  ;;  %v800_v30 = vpack.c.bf16 %v771_v23, %v770_v14  ;;  %1072 = vst.msk [vmem:[%s1778_s12 + $0x28] sm:$0xff] %vm302_vm0, %v771_v23  ;;  %v748_v17 = vmul.f32 %v1765_v3, %v709_v1 }
 0x15f   : > { %v1311_v34 = vpop.eup %1310  ;;  %v649_v48 = vadd.f32 1e-05, %v617_v0  ;;  %v733_v49 = vmul.f32 %v1765_v3, %v694_v5  ;;  %1087 = vst.msk [vmem:[%s1778_s12 + $0xa0] sm:$0xff] %vm302_vm0, %v786_v32 }
 0x160   : > { %v634_v55 = vadd.f32 1e-05, %v602_v16  ;;  %v1313_v39 = vpop.eup %1312  ;;  %v695_v43 = vmul.f32 %v1311_v34, %v1641_v21  ;;  %v531_v42 = vpop.xlane.xlu1 %530  ;;  %1244 = vmatprep.mubr.msk.bf16.mxu0 %vm302_vm0, %v800_v30  ;;  %v787_v46 = vadd.f32 %v1771_v18, %v748_v17 }
 0x161   : > { %v576_v20 = vpop.xlane.xlu0 %575  ;;  %v710_v36 = vmul.f32 %v1313_v39, %v1650_v59  ;;  %1322 = vrsqrt.f32 %v649_v48  ;;  %v603_v26 = vmul.f32 0.125, %v531_v42  ;;  %v772_v51 = vadd.f32 %v1771_v18, %v733_v49 }
 0x162   : > { %v618_v9 = vmul.f32 0.125, %v576_v20  ;;  %1324 = vrsqrt.f32 %v634_v55  ;;  %v808_v50 = vpack.c.bf16 %v787_v46, %v786_v32  ;;  %1088 = vst.msk [vmem:[%s1778_s12 + $0xa8] sm:$0xff] %vm302_vm0, %v787_v46  ;;  %v734_v21 = vmul.f32 %v1765_v3, %v695_v43 }
 0x163   : > { %v1315_v52 = vpop.eup %1314  ;;  %v635_v11 = vadd.f32 1e-05, %v603_v26  ;;  %v749_v58 = vmul.f32 %v1765_v3, %v710_v36  ;;  %1073 = vst.msk [vmem:[%s1778_s12 + $0x30] sm:$0xff] %vm302_vm0, %v772_v51 }
 0x164   : > { %v650_v53 = vadd.f32 1e-05, %v618_v9  ;;  %v1317_v7 = vpop.eup %1316  ;;  %v711_v59 = vmul.f32 %v1315_v52, %v1653_v25  ;;  %v579_v24 = vpop.xlane.xlu1 %578  ;;  %1260 = vmatprep.mubr.msk.bf16.mxu1 %vm302_vm0, %v808_v50  ;;  %v773_v40 = vadd.f32 %v1771_v18, %v734_v21 }
 0x165   : > { %v534_v62 = vpop.xlane.xlu0 %533  ;;  %v696_v4 = vmul.f32 %v1317_v7, %v1662_v15  ;;  %1326 = vrsqrt.f32 %v635_v11  ;;  %v619_v6 = vmul.f32 0.125, %v579_v24  ;;  %v788_v13 = vadd.f32 %v1771_v18, %v749_v58 }
 0x166   : > { %v604_v56 = vmul.f32 0.125, %v534_v62  ;;  %1328 = vrsqrt.f32 %v650_v53  ;;  %v801_v27 = vpack.c.bf16 %v773_v40, %v772_v51  ;;  %1074 = vst.msk [vmem:[%s1778_s12 + $0x38] sm:$0xff] %vm302_vm0, %v773_v40  ;;  %v750_v25 = vmul.f32 %v1765_v3, %v711_v59 }
 0x167   : > { %v1319_v14 = vpop.eup %1318  ;;  %v651_v2 = vadd.f32 1e-05, %v619_v6  ;;  %v735_v44 = vmul.f32 %v1765_v3, %v696_v4  ;;  %1089 = vst.msk [vmem:[%s1778_s12 + $0xb0] sm:$0xff] %vm302_vm0, %v788_v13 }
 0x168   : > { %v636_v28 = vadd.f32 1e-05, %v604_v56  ;;  %v1321_v22 = vpop.eup %1320  ;;  %v697_v15 = vmul.f32 %v1319_v14, %v1665_v29  ;;  %v537_v60 = vpop.xlane.xlu1 %536  ;;  %1245 = vmatmul.mubr.msk.bf16.gmra.mrb[4].mxu0 %vm302_vm0, %v801_v27  ;;  %v789_v10 = vadd.f32 %v1771_v18, %v750_v25 }
 0x169   : > { %v582_v1 = vpop.xlane.xlu0 %581  ;;  %v712_v61 = vmul.f32 %v1321_v22, %v1674_v31  ;;  %1330 = vrsqrt.f32 %v651_v2  ;;  %v605_v23 = vmul.f32 0.125, %v537_v60  ;;  %v774_v16 = vadd.f32 %v1771_v18, %v735_v44 }
 0x16a   : > { %v620_v5 = vmul.f32 0.125, %v582_v1  ;;  %1332 = vrsqrt.f32 %v636_v28  ;;  %v809_v0 = vpack.c.bf16 %v789_v10, %v788_v13  ;;  %1090 = vst.msk [vmem:[%s1778_s12 + $0xb8] sm:$0xff] %vm302_vm0, %v789_v10  ;;  %v736_v29 = vmul.f32 %v1765_v3, %v697_v15 }
 0x16b   : > { %v1323_v30 = vpop.eup %1322  ;;  %v637_v17 = vadd.f32 1e-05, %v605_v23  ;;  %v751_v34 = vmul.f32 %v1765_v3, %v712_v61  ;;  %1075 = vst.msk [vmem:[%s1778_s12 + $0x40] sm:$0xff] %vm302_vm0, %v774_v16 }
 0x16c   : > { %v652_v32 = vadd.f32 1e-05, %v620_v5  ;;  %v1325_v48 = vpop.eup %1324  ;;  %v713_v31 = vmul.f32 %v1323_v30, %v1677_v33  ;;  %v585_v55 = vpop.xlane.xlu1 %584  ;;  %1261 = vmatmul.mubr.msk.bf16.gmra.mrb[4].mxu1 %vm302_vm0, %v809_v0  ;;  %v775_v39 = vadd.f32 %v1771_v18, %v736_v29 }
 0x16d   : > { %v540_v49 = vpop.xlane.xlu0 %539  ;;  %v698_v43 = vmul.f32 %v1325_v48, %v1686_v47  ;;  %1334 = vrsqrt.f32 %v637_v17  ;;  %v621_v42 = vmul.f32 0.125, %v585_v55  ;;  %v790_v36 = vadd.f32 %v1771_v18, %v751_v34 }
 0x16e   : > { %v606_v20 = vmul.f32 0.125, %v540_v49  ;;  %1336 = vrsqrt.f32 %v652_v32  ;;  %v802_v46 = vpack.c.bf16 %v775_v39, %v774_v16  ;;  %1076 = vst.msk [vmem:[%s1778_s12 + $0x48] sm:$0xff] %vm302_vm0, %v775_v39  ;;  %v752_v33 = vmul.f32 %v1765_v3, %v713_v31 }
 0x16f   : > { %v1327_v26 = vpop.eup %1326  ;;  %v653_v9 = vadd.f32 1e-05, %v621_v42  ;;  %v737_v21 = vmul.f32 %v1765_v3, %v698_v43  ;;  %1091 = vst.msk [vmem:[%s1778_s12 + $0xc0] sm:$0xff] %vm302_vm0, %v790_v36 }
 0x170   : > { %v638_v50 = vadd.f32 1e-05, %v606_v20  ;;  %v1329_v51 = vpop.eup %1328  ;;  %v699_v47 = vmul.f32 %v1327_v26, %v1689_v37  ;;  %v543_v52 = vpop.xlane.xlu1 %542  ;;  %1248 = vmatprep.mubr.msk.bf16.mxu0 %vm302_vm0, %v802_v46  ;;  %v791_v53 = vadd.f32 %v1771_v18, %v752_v33 }
 0x171   : > { %v588_v11 = vpop.xlane.xlu0 %587  ;;  %v714_v58 = vmul.f32 %v1329_v51, %v1698_v63  ;;  %1338 = vrsqrt.f32 %v653_v9  ;;  %v607_v7 = vmul.f32 0.125, %v543_v52  ;;  %v776_v62 = vadd.f32 %v1771_v18, %v737_v21 }
 0x172   : > { %v622_v59 = vmul.f32 0.125, %v588_v11  ;;  %1340 = vrsqrt.f32 %v638_v50  ;;  %v810_v24 = vpack.c.bf16 %v791_v53, %v790_v36  ;;  %1092 = vst.msk [vmem:[%s1778_s12 + $0xc8] sm:$0xff] %vm302_vm0, %v791_v53  ;;  %v738_v37 = vmul.f32 %v1765_v3, %v699_v47 }
 0x173   : > { %v1331_v40 = vpop.eup %1330  ;;  %v639_v4 = vadd.f32 1e-05, %v607_v7  ;;  %v753_v56 = vmul.f32 %v1765_v3, %v714_v58  ;;  %1077 = vst.msk [vmem:[%s1778_s12 + $0x50] sm:$0xff] %vm302_vm0, %v776_v62 }
 0x174   : > { %v654_v6 = vadd.f32 1e-05, %v622_v59  ;;  %v1333_v27 = vpop.eup %1332  ;;  %v715_v63 = vmul.f32 %v1331_v40, %v1701_v41  ;;  %v591_v25 = vpop.xlane.xlu1 %590  ;;  %1264 = vmatprep.mubr.msk.bf16.mxu1 %vm302_vm0, %v810_v24  ;;  %v777_v13 = vadd.f32 %v1771_v18, %v738_v37 }
 0x175   : > { %v700_v14 = vmul.f32 %v1333_v27, %v1710_v19  ;;  %1342 = vrsqrt.f32 %v639_v4  ;;  %v623_v2 = vmul.f32 0.125, %v591_v25  ;;  %v792_v28 = vadd.f32 %v1771_v18, %v753_v56 }
 0x176   : > { %1344 = vrsqrt.f32 %v654_v6  ;;  %v803_v44 = vpack.c.bf16 %v777_v13, %v776_v62  ;;  %1078 = vst.msk [vmem:[%s1778_s12 + $0x58] sm:$0xff] %vm302_vm0, %v777_v13  ;;  %v754_v41 = vmul.f32 %v1765_v3, %v715_v63 }
 0x177   : > { %v1335_v22 = vpop.eup %1334  ;;  %v655_v15 = vadd.f32 1e-05, %v623_v2  ;;  %1093 = vst.msk [vmem:[%s1778_s12 + $0xd0] sm:$0xff] %vm302_vm0, %v792_v28  ;;  %v739_v60 = vmul.f32 %v1765_v3, %v700_v14 }
 0x178   : > { %v1337_v1 = vpop.eup %1336  ;;  %v701_v19 = vmul.f32 %v1335_v22, %v1713_v45  ;;  %1249 = vmatmul.mubr.msk.bf16.gmra.mrb[8].mxu0 %vm302_vm0, %v803_v44  ;;  %v793_v10 = vadd.f32 %v1771_v18, %v754_v41 }
 0x179   : > { %v716_v61 = vmul.f32 %v1337_v1, %v1725_v35  ;;  %1346 = vrsqrt.f32 %v655_v15  ;;  %v778_v23 = vadd.f32 %v1771_v18, %v739_v60 }
 0x17a   : > { %v811_v5 = vpack.c.bf16 %v793_v10, %v792_v28  ;;  %1094 = vst.msk [vmem:[%s1778_s12 + $0xd8] sm:$0xff] %vm302_vm0, %v793_v10  ;;  %v740_v0 = vmul.f32 %v1765_v3, %v701_v19 }
 0x17b   : > { %v1339_v29 = vpop.eup %1338  ;;  %1079 = vst.msk [vmem:[%s1778_s12 + $0x60] sm:$0xff] %vm302_vm0, %v778_v23  ;;  %v755_v45 = vmul.f32 %v1765_v3, %v716_v61 }
 0x17c   : > { %v1341_v16 = vpop.eup %1340  ;;  %v717_v30 = vmul.f32 %v1339_v29, %v1728_v38  ;;  %1265 = vmatmul.mubr.msk.bf16.gmra.mrb[8].mxu1 %vm302_vm0, %v811_v5  ;;  %v779_v35 = vadd.f32 %v1771_v18, %v740_v0 }
 0x17d   : > { %v702_v17 = vmul.f32 %v1341_v16, %v1737_v54  ;;  %v794_v32 = vadd.f32 %v1771_v18, %v755_v45 }
 0x17e   : > { %v804_v34 = vpack.c.bf16 %v779_v35, %v778_v23  ;;  %1080 = vst.msk [vmem:[%s1778_s12 + $0x68] sm:$0xff] %vm302_vm0, %v779_v35  ;;  %v756_v48 = vmul.f32 %v1765_v3, %v717_v30 }
 0x17f   : > { %v1343_v31 = vpop.eup %1342  ;;  %1095 = vst.msk [vmem:[%s1778_s12 + $0xe0] sm:$0xff] %vm302_vm0, %v794_v32  ;;  %v741_v38 = vmul.f32 %v1765_v3, %v702_v17 }
 0x180   : > { %v1345_v55 = vpop.eup %1344  ;;  %v703_v49 = vmul.f32 %v1343_v31, %v1740_v8  ;;  %1252 = vmatprep.mubr.msk.bf16.mxu0 %vm302_vm0, %v804_v34  ;;  %v795_v54 = vadd.f32 %v1771_v18, %v756_v48 }
 0x181   : > { %v718_v39 = vmul.f32 %v1345_v55, %v1749_v12  ;;  %v780_v43 = vadd.f32 %v1771_v18, %v741_v38 }
 0x182   : > { %v812_v42 = vpack.c.bf16 %v795_v54, %v794_v32  ;;  %1096 = vst.msk [vmem:[%s1778_s12 + $0xe8] sm:$0xff] %vm302_vm0, %v795_v54  ;;  %v742_v20 = vmul.f32 %v1765_v3, %v703_v49 }
 0x183   : > { %v1347_v46 = vpop.eup %1346  ;;  %1081 = vst.msk [vmem:[%s1778_s12 + $0x70] sm:$0xff] %vm302_vm0, %v780_v43  ;;  %v757_v8 = vmul.f32 %v1765_v3, %v718_v39 }
 0x184   : > { %v719_v33 = vmul.f32 %v1347_v46, %v1752_v57  ;;  %1268 = vmatprep.mubr.msk.bf16.mxu1 %vm302_vm0, %v812_v42  ;;  %v781_v12 = vadd.f32 %v1771_v18, %v742_v20  ;;  %v1957_v57 = vld [vmem:[%s2068_s4] ss:$0 sm:$0xff] }
 0x185   : > { %v796_v36 = vadd.f32 %v1771_v18, %v757_v8 }
 0x186   : > { %v805_v26 = vpack.c.bf16 %v781_v12, %v780_v43  ;;  %1082 = vst.msk [vmem:[%s1778_s12 + $0x78] sm:$0xff] %vm302_vm0, %v781_v12  ;;  %v758_v9 = vmul.f32 %v1765_v3, %v719_v33 }
 0x187   : > { %1097 = vst.msk [vmem:[%s1778_s12 + $0xf0] sm:$0xff] %vm302_vm0, %v796_v36 }
 0x188   : > { %1253 = vmatmul.mubr.msk.bf16.gmra.mrb[12].mxu0 %vm302_vm0, %v805_v26  ;;  %v797_v50 = vadd.f32 %v1771_v18, %v758_v9 }
 0x18a   : > { %v813_v21 = vpack.c.bf16 %v797_v50, %v796_v36  ;;  %1098 = vst.msk [vmem:[%s1778_s12 + $0xf8] sm:$0xff] %vm302_vm0, %v797_v50 }
 0x18c   : > { %1269 = vmatmul.mubr.msk.bf16.gmra.mrb[12].mxu1 %vm302_vm0, %v813_v21 }
 0x22b   : > { %v1242_v3 = vpop.f32.mrb[0].mxu0 }
 0x22c   : > { %v917_v18 = vadd.f32 %v1242_v3, %v1957_v57  ;;  %v908_v51 = vpop.f32.mrb[1].mxu0 }
 0x22d   : > { %v909_v47 = vadd.f32 %v1957_v57, %v908_v51  ;;  %v1243_v52 = vpop.f32.mrb[2].mxu0 }
 0x22e   : > { %1037 = vst.msk [vmem:[%s1963_s17 + $0x10] sm:$0xff] %vm302_vm0, %v917_v18  ;;  %v920_v11 = vadd.f32 %v1243_v52, %v1957_v57  ;;  %v911_v53 = vpop.f32.mrb[3].mxu0 }
 0x22f   : > { %1035 = vst.msk [vmem:[%s1963_s17] sm:$0xff] %vm302_vm0, %v909_v47  ;;  %v912_v58 = vadd.f32 %v1957_v57, %v911_v53  ;;  %v1258_v7 = vpop.f32.mrb[0].mxu1 }
 0x230   : > { %1038 = vst.msk [vmem:[%s1963_s17 + $0x18] sm:$0xff] %vm302_vm0, %v920_v11  ;;  %v981_v59 = vadd.f32 %v1258_v7, %v1957_v57  ;;  %v972_v24 = vpop.f32.mrb[1].mxu1 }
 0x231   : > { %1036 = vst.msk [vmem:[%s1963_s17 + $0x8] sm:$0xff] %vm302_vm0, %v912_v58  ;;  %v973_v37 = vadd.f32 %v1957_v57, %v972_v24  ;;  %v1259_v62 = vpop.f32.mrb[2].mxu1 }
 0x232   : > { %1053 = vst.msk [vmem:[%s1963_s17 + $0x90] sm:$0xff] %vm302_vm0, %v981_v59  ;;  %v984_v40 = vadd.f32 %v1259_v62, %v1957_v57  ;;  %v975_v4 = vpop.f32.mrb[3].mxu1 }
 0x233   : > { %1051 = vst.msk [vmem:[%s1963_s17 + $0x80] sm:$0xff] %vm302_vm0, %v973_v37  ;;  %v976_v6 = vadd.f32 %v1957_v57, %v975_v4 }
 0x234   : > { %1054 = vst.msk [vmem:[%s1963_s17 + $0x98] sm:$0xff] %vm302_vm0, %v984_v40 }
 0x235   : > { %1052 = vst.msk [vmem:[%s1963_s17 + $0x88] sm:$0xff] %vm302_vm0, %v976_v6 }
 0x23b   : > { %v1246_v56 = vpop.f32.mrb[4].mxu0 }
 0x23c   : > { %v933_v27 = vadd.f32 %v1246_v56, %v1957_v57  ;;  %v924_v63 = vpop.f32.mrb[5].mxu0 }
 0x23d   : > { %v925_v25 = vadd.f32 %v1957_v57, %v924_v63  ;;  %v1247_v13 = vpop.f32.mrb[6].mxu0 }
 0x23e   : > { %1041 = vst.msk [vmem:[%s1963_s17 + $0x30] sm:$0xff] %vm302_vm0, %v933_v27  ;;  %v936_v14 = vadd.f32 %v1247_v13, %v1957_v57  ;;  %v927_v2 = vpop.f32.mrb[7].mxu0 }
 0x23f   : > { %1039 = vst.msk [vmem:[%s1963_s17 + $0x20] sm:$0xff] %vm302_vm0, %v925_v25  ;;  %v928_v28 = vadd.f32 %v1957_v57, %v927_v2  ;;  %v1262_v44 = vpop.f32.mrb[4].mxu1 }
 0x240   : > { %1042 = vst.msk [vmem:[%s1963_s17 + $0x38] sm:$0xff] %vm302_vm0, %v936_v14  ;;  %v997_v41 = vadd.f32 %v1262_v44, %v1957_v57  ;;  %v988_v22 = vpop.f32.mrb[5].mxu1 }
 0x241   : > { %1040 = vst.msk [vmem:[%s1963_s17 + $0x28] sm:$0xff] %vm302_vm0, %v928_v28  ;;  %v989_v15 = vadd.f32 %v1957_v57, %v988_v22  ;;  %v1263_v60 = vpop.f32.mrb[6].mxu1 }
 0x242   : > { %1057 = vst.msk [vmem:[%s1963_s17 + $0xb0] sm:$0xff] %vm302_vm0, %v997_v41  ;;  %v1000_v1 = vadd.f32 %v1263_v60, %v1957_v57  ;;  %v991_v19 = vpop.f32.mrb[7].mxu1 }
 0x243   : > { %1055 = vst.msk [vmem:[%s1963_s17 + $0xa0] sm:$0xff] %vm302_vm0, %v989_v15  ;;  %v992_v10 = vadd.f32 %v1957_v57, %v991_v19 }
 0x244   : > { %1058 = vst.msk [vmem:[%s1963_s17 + $0xb8] sm:$0xff] %vm302_vm0, %v1000_v1 }
 0x245   : > { %1056 = vst.msk [vmem:[%s1963_s17 + $0xa8] sm:$0xff] %vm302_vm0, %v992_v10 }
 0x24b   : > { %v1250_v61 = vpop.f32.mrb[8].mxu0 }
 0x24c   : > { %v949_v23 = vadd.f32 %v1250_v61, %v1957_v57  ;;  %v940_v5 = vpop.f32.mrb[9].mxu0 }
 0x24d   : > { %v941_v0 = vadd.f32 %v1957_v57, %v940_v5  ;;  %v1251_v29 = vpop.f32.mrb[10].mxu0 }
 0x24e   : > { %1045 = vst.msk [vmem:[%s1963_s17 + $0x50] sm:$0xff] %vm302_vm0, %v949_v23  ;;  %v952_v45 = vadd.f32 %v1251_v29, %v1957_v57  ;;  %v943_v16 = vpop.f32.mrb[11].mxu0 }
 0x24f   : > { %1043 = vst.msk [vmem:[%s1963_s17 + $0x40] sm:$0xff] %vm302_vm0, %v941_v0  ;;  %v944_v30 = vadd.f32 %v1957_v57, %v943_v16  ;;  %v1266_v35 = vpop.f32.mrb[8].mxu1 }
 0x250   : > { %1046 = vst.msk [vmem:[%s1963_s17 + $0x58] sm:$0xff] %vm302_vm0, %v952_v45  ;;  %v1013_v17 = vadd.f32 %v1266_v35, %v1957_v57  ;;  %v1004_v32 = vpop.f32.mrb[9].mxu1 }
 0x251   : > { %1044 = vst.msk [vmem:[%s1963_s17 + $0x48] sm:$0xff] %vm302_vm0, %v944_v30  ;;  %v1005_v34 = vadd.f32 %v1957_v57, %v1004_v32  ;;  %v1267_v48 = vpop.f32.mrb[10].mxu1 }
 0x252   : > { %1061 = vst.msk [vmem:[%s1963_s17 + $0xd0] sm:$0xff] %vm302_vm0, %v1013_v17  ;;  %v1016_v31 = vadd.f32 %v1267_v48, %v1957_v57  ;;  %v1007_v38 = vpop.f32.mrb[11].mxu1 }
 0x253   : > { %1059 = vst.msk [vmem:[%s1963_s17 + $0xc0] sm:$0xff] %vm302_vm0, %v1005_v34  ;;  %v1008_v55 = vadd.f32 %v1957_v57, %v1007_v38 }
 0x254   : > { %1062 = vst.msk [vmem:[%s1963_s17 + $0xd8] sm:$0xff] %vm302_vm0, %v1016_v31 }
 0x255   : > { %1060 = vst.msk [vmem:[%s1963_s17 + $0xc8] sm:$0xff] %vm302_vm0, %v1008_v55 }
 0x25b   : > { %v1254_v49 = vpop.f32.mrb[12].mxu0 }
 0x25c   : > { %v965_v54 = vadd.f32 %v1254_v49, %v1957_v57  ;;  %v956_v39 = vpop.f32.mrb[13].mxu0 }
 0x25d   : > { %v957_v43 = vadd.f32 %v1957_v57, %v956_v39  ;;  %v1255_v42 = vpop.f32.mrb[14].mxu0 }
 0x25e   : > { %1049 = vst.msk [vmem:[%s1963_s17 + $0x70] sm:$0xff] %vm302_vm0, %v965_v54  ;;  %v968_v20 = vadd.f32 %v1255_v42, %v1957_v57  ;;  %v959_v46 = vpop.f32.mrb[15].mxu0 }
 0x25f   : > { %1047 = vst.msk [vmem:[%s1963_s17 + $0x60] sm:$0xff] %vm302_vm0, %v957_v43  ;;  %v960_v8 = vadd.f32 %v1957_v57, %v959_v46  ;;  %v1270_v33 = vpop.f32.mrb[12].mxu1 }
 0x260   : > { %1050 = vst.msk [vmem:[%s1963_s17 + $0x78] sm:$0xff] %vm302_vm0, %v968_v20  ;;  %v1029_v12 = vadd.f32 %v1270_v33, %v1957_v57  ;;  %v1020_v36 = vpop.f32.mrb[13].mxu1 }
 0x261   : > { %1048 = vst.msk [vmem:[%s1963_s17 + $0x68] sm:$0xff] %vm302_vm0, %v960_v8  ;;  %v1021_v26 = vadd.f32 %v1957_v57, %v1020_v36  ;;  %v1271_v9 = vpop.f32.mrb[14].mxu1 }
 0x262   : > { %1065 = vst.msk [vmem:[%s1963_s17 + $0xf0] sm:$0xff] %vm302_vm0, %v1029_v12  ;;  %v1032_v50 = vadd.f32 %v1271_v9, %v1957_v57  ;;  %v1023_v21 = vpop.f32.mrb[15].mxu1 }
 0x263   : > { %1063 = vst.msk [vmem:[%s1963_s17 + $0xe0] sm:$0xff] %vm302_vm0, %v1021_v26  ;;  %v1024_v3 = vadd.f32 %v1957_v57, %v1023_v21 }
 0x264   : > { %1066 = vst.msk [vmem:[%s1963_s17 + $0xf8] sm:$0xff] %vm302_vm0, %v1032_v50 }
 0x265   : > { %1064 = vst.msk [vmem:[%s1963_s17 + $0xe8] sm:$0xff] %vm302_vm0, %v1024_v3 }
 0x266 PF: > { %s17_s21 = sadd.s32 1, %s1354_s21  }
 0x267   : > { %p14_p4 = scmp.ge.s32.totalorder %s17_s21, 4  }
 0x269   :  { %16 = sbr.rel (!%p14_p4) target bundleno = 1 (0x1), region = 82 }

</bundles_post_ra>
